<compile_context>
chip_gen: v7x
topology: tpu7x:2x2x1
jax: 0.10.0
libtpu: 0.0.40
codegen_flags: <defaults>
</compile_context>

<pallas_src>
import functools

import jax
import jax.numpy as jnp
from jax import lax
from jax.experimental import pallas as pl
from jax.experimental.pallas import tpu as pltpu


def _round_up(x, m):
    return ((x + m - 1) // m) * m


# ---------------------------------------------------------------------------
# Pallas kernels
# ---------------------------------------------------------------------------
def _matmul_kernel(a_ref, b_ref, o_ref, acc_ref):
    # grid = (M tiles, K tiles); K is the reduction axis (innermost, "arbitrary").
    @pl.when(pl.program_id(1) == 0)
    def _():
        acc_ref[...] = jnp.zeros_like(acc_ref)

    acc_ref[...] += jnp.dot(a_ref[...], b_ref[...],
                            preferred_element_type=jnp.float32)

    @pl.when(pl.program_id(1) == pl.num_programs(1) - 1)
    def _():
        o_ref[...] = acc_ref[...]


def _bn_stats_kernel(y_ref, stat_ref, sum_ref, sq_ref):
    # Per-channel sum / sum-of-squares accumulated over M tiles.  Padded rows of
    # y are exactly zero, so no row mask is needed; the wrapper divides by the
    # real row count M.
    i = pl.program_id(0)

    @pl.when(i == 0)
    def _():
        sum_ref[...] = jnp.zeros_like(sum_ref)
        sq_ref[...] = jnp.zeros_like(sq_ref)

    y = y_ref[...]
    sum_ref[...] += jnp.sum(y, axis=0, keepdims=True)
    sq_ref[...] += jnp.sum(y * y, axis=0, keepdims=True)

    @pl.when(i == pl.num_programs(0) - 1)
    def _():
        stat_ref[...] = jnp.concatenate([sum_ref[...], sq_ref[...]], axis=0)


def _bn_apply_kernel(y_ref, scale_ref, shift_ref, o_ref):
    # Normalize (pre-folded scale/shift) + ReLU; lane-dense (Cp = multiple of 128).
    o_ref[...] = jnp.maximum(y_ref[...] * scale_ref[...] + shift_ref[...], 0.0)


# ---------------------------------------------------------------------------
# Glue: im2col patch extraction (plain JAX, bf16)
# ---------------------------------------------------------------------------
def _im2col_3d(x_ndhwc, k, stride, padding):
    N, D, H, W, C = x_ndhwc.shape
    xp = jnp.pad(
        x_ndhwc,
        ((0, 0), (padding, padding), (padding, padding), (padding, padding), (0, 0)),
    )
    Dp, Hp, Wp = D + 2 * padding, H + 2 * padding, W + 2 * padding
    Do = (Dp - k) // stride + 1
    Ho = (Hp - k) // stride + 1
    Wo = (Wp - k) // stride + 1

    cols = []
    for kd in range(k):
        for kh in range(k):
            for kw in range(k):
                patch = xp[
                    :,
                    kd: kd + stride * Do: stride,
                    kh: kh + stride * Ho: stride,
                    kw: kw + stride * Wo: stride,
                    :,
                ]
                cols.append(patch)
    patches = jnp.concatenate(cols, axis=-1)            # (N, Do, Ho, Wo, k^3 * C)
    return patches.reshape(N * Do * Ho * Wo, k * k * k * C), (Do, Ho, Wo)


# ---------------------------------------------------------------------------
# BasicConv forward: Conv3d(bias=False) -> BatchNorm3d(train) -> ReLU
# ---------------------------------------------------------------------------
def basic_conv_forward(x_ncdhw, weight, gamma, beta, *, stride=1, padding=0, eps=1e-5):
    """x_ncdhw: (N, Cin, D, H, W); weight: (Cout, Cin, k, k, k); gamma/beta: (Cout,)."""
    N, Cin, D, H, W = x_ncdhw.shape
    Cout, _, k, _, _ = weight.shape

    # NCDHW -> NDHWC, bf16 for the MXU (accumulation stays f32 inside the kernel).
    x_ndhwc = jnp.transpose(x_ncdhw, (0, 2, 3, 4, 1)).astype(jnp.bfloat16)
    patches, (Do, Ho, Wo) = _im2col_3d(x_ndhwc, k, stride, padding)      # (M, K) bf16
    M, K = patches.shape

    # Tiling: Cout padded to 128 lanes; M tiles of 256-512 rows; K tiled to keep
    # VMEM bounded (matters for large Cin; here Kp = 128 -> a single K step).
    Cp = _round_up(Cout, 128)
    Kp = _round_up(K, 128)
    TM = 512 if M >= 512 else _round_up(M, 256)
    Mp = _round_up(M, TM)
    TK = 512 if Kp % 512 == 0 else (256 if Kp % 256 == 0 else 128)

    # weight -> (Kp, Cp) bf16 matching patch ordering (kd, kh, kw, ci).
    w_mat = jnp.transpose(weight.astype(jnp.bfloat16), (2, 3, 4, 1, 0)).reshape(K, Cout)
    a = jnp.pad(patches, ((0, Mp - M), (0, Kp - K)))
    b = jnp.pad(w_mat, ((0, Kp - K), (0, Cp - Cout)))

    # ---- Pallas conv-as-matmul: K-tiled with f32 accumulator ----
    y = pl.pallas_call(
        _matmul_kernel,
        out_shape=jax.ShapeDtypeStruct((Mp, Cp), jnp.float32),
        grid=(Mp // TM, Kp // TK),
        in_specs=[
            pl.BlockSpec((TM, TK), lambda i, kk: (i, kk)),
            pl.BlockSpec((TK, Cp), lambda i, kk: (kk, 0)),
        ],
        out_specs=pl.BlockSpec((TM, Cp), lambda i, kk: (i, 0)),
        scratch_shapes=[pltpu.VMEM((TM, Cp), jnp.float32)],
        compiler_params=pltpu.CompilerParams(
            dimension_semantics=("parallel", "arbitrary")),
    )(a, b)

    # ---- Pass 1: per-channel sum / sumsq (tiled reduction over M) ----
    stats = pl.pallas_call(
        _bn_stats_kernel,
        out_shape=jax.ShapeDtypeStruct((2, Cp), jnp.float32),
        grid=(Mp // TM,),
        in_specs=[pl.BlockSpec((TM, Cp), lambda i: (i, 0))],
        out_specs=pl.BlockSpec((2, Cp), lambda i: (0, 0)),
        scratch_shapes=[pltpu.VMEM((1, Cp), jnp.float32),
                        pltpu.VMEM((1, Cp), jnp.float32)],
        compiler_params=pltpu.CompilerParams(dimension_semantics=("arbitrary",)),
    )(y)

    # Fold BN (train-mode batch stats, biased variance) + affine into scale/shift.
    cnt = jnp.float32(M)
    mean = stats[0:1, :] / cnt                             # (1, Cp)
    var = stats[1:2, :] / cnt - mean * mean                # biased variance
    inv = lax.rsqrt(var + eps)
    gamma_p = jnp.pad(gamma.astype(jnp.float32), (0, Cp - Cout)).reshape(1, Cp)
    beta_p = jnp.pad(beta.astype(jnp.float32), (0, Cp - Cout)).reshape(1, Cp)
    scale = gamma_p * inv
    shift = beta_p - mean * scale

    # ---- Pass 2: normalize + ReLU, tiled over M (parallel), aliasing y's buffer ----
    out_flat = pl.pallas_call(
        _bn_apply_kernel,
        out_shape=jax.ShapeDtypeStruct((Mp, Cp), jnp.float32),
        grid=(Mp // TM,),
        in_specs=[
            pl.BlockSpec((TM, Cp), lambda i: (i, 0)),
            pl.BlockSpec((1, Cp), lambda i: (0, 0)),
            pl.BlockSpec((1, Cp), lambda i: (0, 0)),
        ],
        out_specs=pl.BlockSpec((TM, Cp), lambda i: (i, 0)),
        input_output_aliases={0: 0},
        compiler_params=pltpu.CompilerParams(dimension_semantics=("parallel",)),
    )(y, scale, shift)

    # Strip M / Cout padding, back to NCDHW.
    out = out_flat[:M, :Cout].reshape(N, Do, Ho, Wo, Cout)
    return jnp.transpose(out, (0, 4, 1, 2, 3))


# ---------------------------------------------------------------------------
# Pure-JAX reference (bf16-rounded inputs to isolate kernel correctness)
# ---------------------------------------------------------------------------
def _reference(x_ncdhw, weight, gamma, beta, *, stride=1, padding=0, eps=1e-5):
    xb = x_ncdhw.astype(jnp.bfloat16).astype(jnp.float32)
    wb = weight.astype(jnp.bfloat16).astype(jnp.float32)
    y = lax.conv_general_dilated(
        xb, wb,
        window_strides=(stride, stride, stride),
        padding=[(padding, padding)] * 3,
        dimension_numbers=("NCDHW", "OIDHW", "NCDHW"),
        preferred_element_type=jnp.float32,
    )
    mean = jnp.mean(y, axis=(0, 2, 3, 4), keepdims=True)
    var = jnp.mean((y - mean) ** 2, axis=(0, 2, 3, 4), keepdims=True)
    yhat = (y - mean) * lax.rsqrt(var + eps)
    g = gamma.reshape(1, -1, 1, 1, 1)
    bta = beta.reshape(1, -1, 1, 1, 1)
    return jnp.maximum(yhat * g + bta, 0.0)


# ---------------------------------------------------------------------------
if __name__ == "__main__":
    # BasicConv(in_planes=4, out_planes=8, kernel_size=3, stride=1, padding=1)
    N, Cin, D, H, W = 2, 4, 8, 8, 8
    Cout, ksz, stride, padding = 8, 3, 1, 1

    key = jax.random.PRNGKey(0)
    kx, kw_, kg, kb = jax.random.split(key, 4)

    x = jax.random.normal(kx, (N, Cin, D, H, W), jnp.float32)
    weight = 0.1 * jax.random.normal(kw_, (Cout, Cin, ksz, ksz, ksz), jnp.float32)
    gamma = 1.0 + 0.1 * jax.random.normal(kg, (Cout,), jnp.float32)
    beta = 0.05 * jax.random.normal(kb, (Cout,), jnp.float32)

    fwd = jax.jit(functools.partial(basic_conv_forward, stride=stride, padding=padding))
    out = jax.block_until_ready(fwd(x, weight, gamma, beta))

    ref = _reference(x, weight, gamma, beta, stride=stride, padding=padding)
    assert out.shape == ref.shape == (N, Cout, D, H, W), (out.shape, ref.shape)
    max_err = float(jnp.max(jnp.abs(out - ref)))
    assert jnp.allclose(out, ref, atol=5e-3, rtol=5e-3), max_err

    print("KERNEL_OK")
</pallas_src>

<mosaic_0001>
module attributes {stable_mosaic.version = 11 : i64} {
  func.func @_matmul_kernel(%arg0: i32, %arg1: i32, %arg2: memref<512x128xbf16, #tpu.memory_space<vmem>>, %arg3: memref<128x128xbf16, #tpu.memory_space<vmem>>, %arg4: memref<512x128xf32, #tpu.memory_space<vmem>>, %arg5: memref<512x128xf32, #tpu.memory_space<vmem>>) attributes {dimension_semantics = [#tpu.dimension_semantics<parallel>, #tpu.dimension_semantics<arbitrary>], iteration_bounds = array<i64: 2, 1>, scalar_prefetch = 0 : i64, scratch_operands = 1 : i64, tpu.core_type = #tpu.core_type<tc>, window_params = [{transform_indices = @transform_0, window_bounds = array<i64: 512, 128>}, {transform_indices = @transform_1, window_bounds = array<i64: 128, 128>}, {transform_indices = @transform_2, window_bounds = array<i64: 512, 128>}]} {
    %c0_i32 = arith.constant 0 : i32
    %0 = arith.cmpi eq, %arg1, %c0_i32 : i32
    %1 = arith.extui %0 : i1 to i32
    %c0_i32_0 = arith.constant 0 : i32
    %2 = arith.cmpi ne, %1, %c0_i32_0 : i32
    scf.if %2 {
      %cst_10 = arith.constant 0.000000e+00 : f32
      %12 = vector.broadcast %cst_10 : f32 to vector<512x128xf32>
      %c0_11 = arith.constant 0 : index
      %c0_12 = arith.constant 0 : index
      %13 = vector.load %arg5[%c0_11, %c0_12] : memref<512x128xf32, #tpu.memory_space<vmem>>, vector<512x128xf32>
      tpu.vector_store %arg5[%c0_11, %c0_12], %12 {strides = array<i32>} : memref<512x128xf32, #tpu.memory_space<vmem>>, vector<512x128xf32>,
    } else {
    }
    %c0 = arith.constant 0 : index
    %c0_1 = arith.constant 0 : index
    %3 = vector.load %arg5[%c0, %c0_1] : memref<512x128xf32, #tpu.memory_space<vmem>>, vector<512x128xf32>
    %c0_2 = arith.constant 0 : index
    %c0_3 = arith.constant 0 : index
    %4 = vector.load %arg2[%c0_2, %c0_3] : memref<512x128xbf16, #tpu.memory_space<vmem>>, vector<512x128xbf16>
    %c0_4 = arith.constant 0 : index
    %c0_5 = arith.constant 0 : index
    %5 = vector.load %arg3[%c0_4, %c0_5] : memref<128x128xbf16, #tpu.memory_space<vmem>>, vector<128x128xbf16>
    %cst = arith.constant dense<0.000000e+00> : vector<512x128xf32>
    %6 = tpu.matmul %4, %5, %cst {dimension_numbers = #tpu.dot_dimension_numbers<[1], [0], [0], [1], [0, 0, 1, 1], [], []>} : vector<512x128xbf16>, vector<128x128xbf16>, vector<512x128xf32> -> vector<512x128xf32>
    %7 = arith.addf %3, %6 : vector<512x128xf32>
    %c0_6 = arith.constant 0 : index
    %c0_7 = arith.constant 0 : index
    %8 = vector.load %arg5[%c0_6, %c0_7] : memref<512x128xf32, #tpu.memory_space<vmem>>, vector<512x128xf32>
    tpu.vector_store %arg5[%c0_6, %c0_7], %7 {strides = array<i32>} : memref<512x128xf32, #tpu.memory_space<vmem>>, vector<512x128xf32>,
    %c0_i32_8 = arith.constant 0 : i32
    %9 = arith.cmpi eq, %arg1, %c0_i32_8 : i32
    %10 = arith.extui %9 : i1 to i32
    %c0_i32_9 = arith.constant 0 : i32
    %11 = arith.cmpi ne, %10, %c0_i32_9 : i32
    scf.if %11 {
      %c0_10 = arith.constant 0 : index
      %c0_11 = arith.constant 0 : index
      %12 = vector.load %arg5[%c0_10, %c0_11] : memref<512x128xf32, #tpu.memory_space<vmem>>, vector<512x128xf32>
      %c0_12 = arith.constant 0 : index
      %c0_13 = arith.constant 0 : index
      %13 = vector.load %arg4[%c0_12, %c0_13] : memref<512x128xf32, #tpu.memory_space<vmem>>, vector<512x128xf32>
      tpu.vector_store %arg4[%c0_12, %c0_13], %12 {strides = array<i32>} : memref<512x128xf32, #tpu.memory_space<vmem>>, vector<512x128xf32>,
    } else {
    }
    return
  }
  func.func @transform_0(%arg0: i32, %arg1: i32) -> (i32, i32) {
    %c0_i32 = arith.constant 0 : i32
    return %arg0, %arg1 : i32, i32
  }
  func.func @transform_1(%arg0: i32, %arg1: i32) -> (i32, i32) {
    %c0_i32 = arith.constant 0 : i32
    %c0_i32_0 = arith.constant 0 : i32
    return %arg1, %c0_i32 : i32, i32
  }
  func.func @transform_2(%arg0: i32, %arg1: i32) -> (i32, i32) {
    %c0_i32 = arith.constant 0 : i32
    %c0_i32_0 = arith.constant 0 : i32
    return %arg0, %c0_i32 : i32, i32
  }
}

module attributes {stable_mosaic.version = 11 : i64} {
  func.func @_bn_stats_kernel(%arg0: i32, %arg1: memref<512x128xf32, #tpu.memory_space<vmem>>, %arg2: memref<2x128xf32, #tpu.memory_space<vmem>>, %arg3: memref<1x128xf32, #tpu.memory_space<vmem>>, %arg4: memref<1x128xf32, #tpu.memory_space<vmem>>) attributes {dimension_semantics = [#tpu.dimension_semantics<arbitrary>], iteration_bounds = array<i64: 2>, scalar_prefetch = 0 : i64, scratch_operands = 2 : i64, tpu.core_type = #tpu.core_type<tc>, window_params = [{transform_indices = @transform_0, window_bounds = array<i64: 512, 128>}, {pipeline_mode = #tpu.pipeline_mode<synchronous>, transform_indices = @transform_1, window_bounds = array<i64: 2, 128>}]} {
    %c0_i32 = arith.constant 0 : i32
    %0 = arith.cmpi eq, %arg0, %c0_i32 : i32
    %1 = arith.extui %0 : i1 to i32
    %c0_i32_0 = arith.constant 0 : i32
    %2 = arith.cmpi ne, %1, %c0_i32_0 : i32
    scf.if %2 {
      %cst_12 = arith.constant 0.000000e+00 : f32
      %18 = vector.broadcast %cst_12 : f32 to vector<1x128xf32>
      %c0_13 = arith.constant 0 : index
      %c0_14 = arith.constant 0 : index
      %19 = vector.load %arg3[%c0_13, %c0_14] : memref<1x128xf32, #tpu.memory_space<vmem>>, vector<1x128xf32>
      tpu.vector_store %arg3[%c0_13, %c0_14], %18 {strides = array<i32>} : memref<1x128xf32, #tpu.memory_space<vmem>>, vector<1x128xf32>,
      %cst_15 = arith.constant 0.000000e+00 : f32
      %20 = vector.broadcast %cst_15 : f32 to vector<1x128xf32>
      %c0_16 = arith.constant 0 : index
      %c0_17 = arith.constant 0 : index
      %21 = vector.load %arg4[%c0_16, %c0_17] : memref<1x128xf32, #tpu.memory_space<vmem>>, vector<1x128xf32>
      tpu.vector_store %arg4[%c0_16, %c0_17], %20 {strides = array<i32>} : memref<1x128xf32, #tpu.memory_space<vmem>>, vector<1x128xf32>,
    } else {
    }
    %c0 = arith.constant 0 : index
    %c0_1 = arith.constant 0 : index
    %3 = vector.load %arg1[%c0, %c0_1] : memref<512x128xf32, #tpu.memory_space<vmem>>, vector<512x128xf32>
    %c0_2 = arith.constant 0 : index
    %c0_3 = arith.constant 0 : index
    %4 = vector.load %arg3[%c0_2, %c0_3] : memref<1x128xf32, #tpu.memory_space<vmem>>, vector<1x128xf32>
    %cst = arith.constant dense<0.000000e+00> : vector<128xf32>
    %5 = vector.multi_reduction <add>, %3, %cst [0] : vector<512x128xf32> to vector<128xf32>
    %6 = vector.shape_cast %5 : vector<128xf32> to vector<1x128xf32>
    %7 = arith.addf %4, %6 : vector<1x128xf32>
    %c0_4 = arith.constant 0 : index
    %c0_5 = arith.constant 0 : index
    %8 = vector.load %arg3[%c0_4, %c0_5] : memref<1x128xf32, #tpu.memory_space<vmem>>, vector<1x128xf32>
    tpu.vector_store %arg3[%c0_4, %c0_5], %7 {strides = array<i32>} : memref<1x128xf32, #tpu.memory_space<vmem>>, vector<1x128xf32>,
    %c0_6 = arith.constant 0 : index
    %c0_7 = arith.constant 0 : index
    %9 = vector.load %arg4[%c0_6, %c0_7] : memref<1x128xf32, #tpu.memory_space<vmem>>, vector<1x128xf32>
    %10 = arith.mulf %3, %3 : vector<512x128xf32>
    %cst_8 = arith.constant dense<0.000000e+00> : vector<128xf32>
    %11 = vector.multi_reduction <add>, %10, %cst_8 [0] : vector<512x128xf32> to vector<128xf32>
    %12 = vector.shape_cast %11 : vector<128xf32> to vector<1x128xf32>
    %13 = arith.addf %9, %12 : vector<1x128xf32>
    %c0_9 = arith.constant 0 : index
    %c0_10 = arith.constant 0 : index
    %14 = vector.load %arg4[%c0_9, %c0_10] : memref<1x128xf32, #tpu.memory_space<vmem>>, vector<1x128xf32>
    tpu.vector_store %arg4[%c0_9, %c0_10], %13 {strides = array<i32>} : memref<1x128xf32, #tpu.memory_space<vmem>>, vector<1x128xf32>,
    %c1_i32 = arith.constant 1 : i32
    %15 = arith.cmpi eq, %arg0, %c1_i32 : i32
    %16 = arith.extui %15 : i1 to i32
    %c0_i32_11 = arith.constant 0 : i32
    %17 = arith.cmpi ne, %16, %c0_i32_11 : i32
    scf.if %17 {
      %c0_12 = arith.constant 0 : index
      %c0_13 = arith.constant 0 : index
      %18 = vector.load %arg3[%c0_12, %c0_13] : memref<1x128xf32, #tpu.memory_space<vmem>>, vector<1x128xf32>
      %c0_14 = arith.constant 0 : index
      %c0_15 = arith.constant 0 : index
      %19 = vector.load %arg4[%c0_14, %c0_15] : memref<1x128xf32, #tpu.memory_space<vmem>>, vector<1x128xf32>
      %20 = tpu.concatenate %18, %19 in 0 : vector<1x128xf32>, vector<1x128xf32> -> vector<2x128xf32>
      %c0_16 = arith.constant 0 : index
      %c0_17 = arith.constant 0 : index
      %21 = vector.load %arg2[%c0_16, %c0_17] : memref<2x128xf32, #tpu.memory_space<vmem>>, vector<2x128xf32>
      tpu.vector_store %arg2[%c0_16, %c0_17], %20 {strides = array<i32>} : memref<2x128xf32, #tpu.memory_space<vmem>>, vector<2x128xf32>,
    } else {
    }
    return
  }
  func.func @transform_0(%arg0: i32) -> (i32, i32) {
    %c0_i32 = arith.constant 0 : i32
    %c0_i32_0 = arith.constant 0 : i32
    return %arg0, %c0_i32 : i32, i32
  }
  func.func @transform_1(%arg0: i32) -> (i32, i32) {
    %c0_i32 = arith.constant 0 : i32
    %c0_i32_0 = arith.constant 0 : i32
    %c0_i32_1 = arith.constant 0 : i32
    return %c0_i32, %c0_i32_0 : i32, i32
  }
}

module attributes {stable_mosaic.version = 11 : i64} {
  func.func @_bn_apply_kernel(%arg0: i32, %arg1: memref<512x128xf32, #tpu.memory_space<vmem>>, %arg2: memref<1x128xf32, #tpu.memory_space<vmem>>, %arg3: memref<1x128xf32, #tpu.memory_space<vmem>>, %arg4: memref<512x128xf32, #tpu.memory_space<vmem>>) attributes {dimension_semantics = [#tpu.dimension_semantics<parallel>], iteration_bounds = array<i64: 2>, scalar_prefetch = 0 : i64, scratch_operands = 0 : i64, tpu.core_type = #tpu.core_type<tc>, window_params = [{transform_indices = @transform_0, window_bounds = array<i64: 512, 128>}, {pipeline_mode = #tpu.pipeline_mode<synchronous>, transform_indices = @transform_1, window_bounds = array<i64: 1, 128>}, {pipeline_mode = #tpu.pipeline_mode<synchronous>, transform_indices = @transform_2, window_bounds = array<i64: 1, 128>}, {transform_indices = @transform_3, window_bounds = array<i64: 512, 128>}]} {
    %c0 = arith.constant 0 : index
    %c0_0 = arith.constant 0 : index
    %0 = vector.load %arg1[%c0, %c0_0] : memref<512x128xf32, #tpu.memory_space<vmem>>, vector<512x128xf32>
    %c0_1 = arith.constant 0 : index
    %c0_2 = arith.constant 0 : index
    %1 = vector.load %arg2[%c0_1, %c0_2] : memref<1x128xf32, #tpu.memory_space<vmem>>, vector<1x128xf32>
    %2 = vector.broadcast %1 : vector<1x128xf32> to vector<512x128xf32>
    %3 = arith.mulf %0, %2 : vector<512x128xf32>
    %c0_3 = arith.constant 0 : index
    %c0_4 = arith.constant 0 : index
    %4 = vector.load %arg3[%c0_3, %c0_4] : memref<1x128xf32, #tpu.memory_space<vmem>>, vector<1x128xf32>
    %5 = vector.broadcast %4 : vector<1x128xf32> to vector<512x128xf32>
    %6 = arith.addf %3, %5 : vector<512x128xf32>
    %cst = arith.constant 0.000000e+00 : f32
    %7 = vector.broadcast %cst : f32 to vector<512x128xf32>
    %8 = arith.maximumf %6, %7 : vector<512x128xf32>
    %c0_5 = arith.constant 0 : index
    %c0_6 = arith.constant 0 : index
    %9 = vector.load %arg4[%c0_5, %c0_6] : memref<512x128xf32, #tpu.memory_space<vmem>>, vector<512x128xf32>
    tpu.vector_store %arg4[%c0_5, %c0_6], %8 {strides = array<i32>} : memref<512x128xf32, #tpu.memory_space<vmem>>, vector<512x128xf32>,
    return
  }
  func.func @transform_0(%arg0: i32) -> (i32, i32) {
    %c0_i32 = arith.constant 0 : i32
    %c0_i32_0 = arith.constant 0 : i32
    return %arg0, %c0_i32 : i32, i32
  }
  func.func @transform_1(%arg0: i32) -> (i32, i32) {
    %c0_i32 = arith.constant 0 : i32
    %c0_i32_0 = arith.constant 0 : i32
    %c0_i32_1 = arith.constant 0 : i32
    return %c0_i32, %c0_i32_0 : i32, i32
  }
  func.func @transform_2(%arg0: i32) -> (i32, i32) {
    %c0_i32 = arith.constant 0 : i32
    %c0_i32_0 = arith.constant 0 : i32
    %c0_i32_1 = arith.constant 0 : i32
    return %c0_i32, %c0_i32_0 : i32, i32
  }
  func.func @transform_3(%arg0: i32) -> (i32, i32) {
    %c0_i32 = arith.constant 0 : i32
    %c0_i32_0 = arith.constant 0 : i32
    return %arg0, %c0_i32 : i32, i32
  }
}

</mosaic_0001>

<bundles_post_ra>
// kernel: basic_conv_forward.4
= control target key start
LH: loop header
LB: loop body
LE: loop exit
PB: predicated region body
PF: predicated region fallthrough
CT: control target
= control target key end

     0   :  { %s464_s6 = smov 0   ;;  %s552_s0 = inlined_call_operand.vmem [shape: f32[1024,128], index: 0, kind: input, shape index: {}]   ;;  %s553_s1 = inlined_call_operand.vmem [shape: f32[2,128], index: 1, kind: output, shape index: {}]  }
   0x1 LB: > { %s470_s7 = sadd.s32 4294967295, %s451_s6   ;;  %p428_p0 = scmp.ge.s32.totalorder %s451_s6, 1  ;;  %s451_s6 = sphi %s464_s6, %s11_s6  }
   0x2   : > { %p83_p1 = scmp.lt.s32.totalorder %s451_s6, 3 }
   0x4   : > { %p84_p2 = pnand %p428_p0, %p83_p1 }
   0x5   : > { %s429_s8 = sshll.u32 (!%p84_p2), %s470_s7, 6  ;;  %p431_p4 = scmp.ne.s32.totalorder (!%p84_p2), %s470_s7, 0 }
   0x6   : > { %87 = sbr.rel (%p84_p2) target bundleno = 173 (0xad), region = 24  ;;  %p99_p3 = scmp.lt.s32.totalorder (!%p84_p2), %s429_s8, 127 }
   0xd   : > { %s555_s8 = smov (!%p99_p3, %s429_s8), 127  ;;  %107 = sbr.rel (%p431_p4) target bundleno = 20 (0x14), region = 28 }
   0xe   : > { %s430_s9 = sshll.u32 %s555_s8, 3  ;;  %v453_v0 = vmov (!%p431_p4), 0.0  }
   0xf   : > { %s478_s12 = scalar_lea.vmem %s552_s0, %s430_s9  ;;  %108 = vst [vmem:[#allocation2] sm:$0x1] (!%p431_p4), %v453_v0  ;;  %109 = vst [vmem:[#allocation3] sm:$0x1] (!%p431_p4), %v453_v0 }
  0x14 PF: > { %v110_v1 = vld [vmem:[%s478_s12] sm:$0xff]  ;;  %v111_v2 = vld [vmem:[%s478_s12 + $0x8] sm:$0xff]  ;;  %v112_v3 = vld [vmem:[%s478_s12 + $0x10] sm:$0xff]  ;;  %p432_p5 = scmp.ne.s32.totalorder %s470_s7, 1 }
  0x15   : > { %v113_v4 = vld [vmem:[%s478_s12 + $0x18] sm:$0xff]  ;;  %v175_v5 = vadd.f32 %v111_v2, %v110_v1  ;;  %v247_v6 = vmul.f32 %v110_v1, %v110_v1  ;;  %v248_v7 = vmul.f32 %v111_v2, %v111_v2  ;;  %v249_v8 = vmul.f32 %v112_v3, %v112_v3  ;;  %v114_v9 = vld [vmem:[%s478_s12 + $0x20] sm:$0xff]  ;;  %v115_v13 = vld [vmem:[%s478_s12 + $0x28] sm:$0xff] }
  0x16   : > { %v250_v11 = vmul.f32 %v113_v4, %v113_v4  ;;  %v251_v15 = vmul.f32 %v114_v9, %v114_v9  ;;  %v116_v17 = vld [vmem:[%s478_s12 + $0x30] sm:$0xff]  ;;  %v252_v19 = vmul.f32 %v115_v13, %v115_v13  ;;  %v117_v21 = vld [vmem:[%s478_s12 + $0x38] sm:$0xff]  ;;  %v118_v25 = vld [vmem:[%s478_s12 + $0x40] sm:$0xff]  ;;  %vm394_vm0 = vcmask (!%p432_p5), 1040384  }
  0x17   : > { %v176_v10 = vadd.f32 %v175_v5, %v112_v3  ;;  %v311_v12 = vadd.f32 %v248_v7, %v247_v6  ;;  %v253_v23 = vmul.f32 %v116_v17, %v116_v17  ;;  %v254_v27 = vmul.f32 %v117_v21, %v117_v21  ;;  %v119_v29 = vld [vmem:[%s478_s12 + $0x48] sm:$0xff]  ;;  %v120_v33 = vld [vmem:[%s478_s12 + $0x50] sm:$0xff]  ;;  %v121_v37 = vld [vmem:[%s478_s12 + $0x58] sm:$0xff] }
  0x18   : > { %v255_v31 = vmul.f32 %v118_v25, %v118_v25  ;;  %v256_v35 = vmul.f32 %v119_v29, %v119_v29  ;;  %v257_v39 = vmul.f32 %v120_v33, %v120_v33  ;;  %v122_v41 = vld [vmem:[%s478_s12 + $0x60] sm:$0xff]  ;;  %v258_v43 = vmul.f32 %v121_v37, %v121_v37  ;;  %v123_v45 = vld [vmem:[%s478_s12 + $0x68] sm:$0xff]  ;;  %v124_v49 = vld [vmem:[%s478_s12 + $0x70] sm:$0xff] }
  0x19   : > { %v177_v14 = vadd.f32 %v176_v10, %v113_v4  ;;  %v312_v16 = vadd.f32 %v311_v12, %v249_v8  ;;  %v259_v47 = vmul.f32 %v122_v41, %v122_v41  ;;  %v260_v51 = vmul.f32 %v123_v45, %v123_v45  ;;  %v125_v53 = vld [vmem:[%s478_s12 + $0x78] sm:$0xff]  ;;  %v126_v57 = vld [vmem:[%s478_s12 + $0x80] sm:$0xff]  ;;  %v127_v61 = vld [vmem:[%s478_s12 + $0x88] sm:$0xff] }
  0x1a   : > { %v261_v55 = vmul.f32 %v124_v49, %v124_v49  ;;  %v262_v59 = vmul.f32 %v125_v53, %v125_v53  ;;  %v263_v63 = vmul.f32 %v126_v57, %v126_v57  ;;  %v128_v1 = vld [vmem:[%s478_s12 + $0x90] sm:$0xff]  ;;  %v264_v3 = vmul.f32 %v127_v61, %v127_v61  ;;  %v129_v5 = vld [vmem:[%s478_s12 + $0x98] sm:$0xff] }
  0x1b   : > { %v178_v18 = vadd.f32 %v177_v14, %v114_v9  ;;  %v313_v20 = vadd.f32 %v312_v16, %v250_v11  ;;  %v265_v7 = vmul.f32 %v128_v1, %v128_v1  ;;  %v130_v9 = vld [vmem:[%s478_s12 + $0xa0] sm:$0xff]  ;;  %v266_v11 = vmul.f32 %v129_v5, %v129_v5 }
  0x1d   : > { %v179_v22 = vadd.f32 %v178_v18, %v115_v13  ;;  %v314_v24 = vadd.f32 %v313_v20, %v251_v15  ;;  %v131_v13 = vld [vmem:[%s478_s12 + $0xa8] sm:$0xff]  ;;  %v267_v15 = vmul.f32 %v130_v9, %v130_v9 }
  0x1f   : > { %v180_v26 = vadd.f32 %v179_v22, %v116_v17  ;;  %v315_v28 = vadd.f32 %v314_v24, %v252_v19  ;;  %v132_v17 = vld [vmem:[%s478_s12 + $0xb0] sm:$0xff]  ;;  %v268_v19 = vmul.f32 %v131_v13, %v131_v13 }
  0x21   : > { %v181_v30 = vadd.f32 %v180_v26, %v117_v21  ;;  %v316_v32 = vadd.f32 %v315_v28, %v253_v23  ;;  %v133_v21 = vld [vmem:[%s478_s12 + $0xb8] sm:$0xff]  ;;  %v269_v23 = vmul.f32 %v132_v17, %v132_v17 }
  0x23   : > { %v182_v34 = vadd.f32 %v181_v30, %v118_v25  ;;  %v317_v36 = vadd.f32 %v316_v32, %v254_v27  ;;  %v134_v25 = vld [vmem:[%s478_s12 + $0xc0] sm:$0xff]  ;;  %v270_v27 = vmul.f32 %v133_v21, %v133_v21 }
  0x25   : > { %v183_v38 = vadd.f32 %v182_v34, %v119_v29  ;;  %v318_v40 = vadd.f32 %v317_v36, %v255_v31  ;;  %v135_v29 = vld [vmem:[%s478_s12 + $0xc8] sm:$0xff]  ;;  %v271_v31 = vmul.f32 %v134_v25, %v134_v25 }
  0x27   : > { %v184_v42 = vadd.f32 %v183_v38, %v120_v33  ;;  %v319_v44 = vadd.f32 %v318_v40, %v256_v35  ;;  %v136_v33 = vld [vmem:[%s478_s12 + $0xd0] sm:$0xff]  ;;  %v272_v35 = vmul.f32 %v135_v29, %v135_v29 }
  0x29   : > { %v185_v46 = vadd.f32 %v184_v42, %v121_v37  ;;  %v320_v48 = vadd.f32 %v319_v44, %v257_v39  ;;  %v137_v37 = vld [vmem:[%s478_s12 + $0xd8] sm:$0xff]  ;;  %v273_v39 = vmul.f32 %v136_v33, %v136_v33 }
  0x2b   : > { %v186_v50 = vadd.f32 %v185_v46, %v122_v41  ;;  %v321_v52 = vadd.f32 %v320_v48, %v258_v43  ;;  %v138_v41 = vld [vmem:[%s478_s12 + $0xe0] sm:$0xff]  ;;  %v274_v43 = vmul.f32 %v137_v37, %v137_v37 }
  0x2d   : > { %v187_v54 = vadd.f32 %v186_v50, %v123_v45  ;;  %v322_v56 = vadd.f32 %v321_v52, %v259_v47  ;;  %v139_v45 = vld [vmem:[%s478_s12 + $0xe8] sm:$0xff]  ;;  %v275_v47 = vmul.f32 %v138_v41, %v138_v41 }
  0x2f   : > { %v188_v58 = vadd.f32 %v187_v54, %v124_v49  ;;  %v323_v60 = vadd.f32 %v322_v56, %v260_v51  ;;  %v140_v49 = vld [vmem:[%s478_s12 + $0xf0] sm:$0xff]  ;;  %v276_v51 = vmul.f32 %v139_v45, %v139_v45 }
  0x31   : > { %v189_v62 = vadd.f32 %v188_v58, %v125_v53  ;;  %v324_v0 = vadd.f32 %v323_v60, %v261_v55  ;;  %v141_v53 = vld [vmem:[%s478_s12 + $0xf8] sm:$0xff]  ;;  %v277_v55 = vmul.f32 %v140_v49, %v140_v49 }
  0x33   : > { %v190_v2 = vadd.f32 %v189_v62, %v126_v57  ;;  %v325_v4 = vadd.f32 %v324_v0, %v262_v59  ;;  %v142_v57 = vld [vmem:[%s478_s12 + $0x100] sm:$0xff]  ;;  %v278_v59 = vmul.f32 %v141_v53, %v141_v53 }
  0x35   : > { %v191_v6 = vadd.f32 %v190_v2, %v127_v61  ;;  %v326_v8 = vadd.f32 %v325_v4, %v263_v63  ;;  %v143_v61 = vld [vmem:[%s478_s12 + $0x108] sm:$0xff]  ;;  %v279_v63 = vmul.f32 %v142_v57, %v142_v57 }
  0x37   : > { %v192_v10 = vadd.f32 %v191_v6, %v128_v1  ;;  %v327_v12 = vadd.f32 %v326_v8, %v264_v3  ;;  %v144_v1 = vld [vmem:[%s478_s12 + $0x110] sm:$0xff]  ;;  %v280_v3 = vmul.f32 %v143_v61, %v143_v61 }
  0x39   : > { %v193_v14 = vadd.f32 %v192_v10, %v129_v5  ;;  %v328_v16 = vadd.f32 %v327_v12, %v265_v7  ;;  %v145_v5 = vld [vmem:[%s478_s12 + $0x118] sm:$0xff]  ;;  %v281_v7 = vmul.f32 %v144_v1, %v144_v1 }
  0x3b   : > { %v194_v18 = vadd.f32 %v193_v14, %v130_v9  ;;  %v329_v20 = vadd.f32 %v328_v16, %v266_v11  ;;  %v146_v9 = vld [vmem:[%s478_s12 + $0x120] sm:$0xff]  ;;  %v282_v11 = vmul.f32 %v145_v5, %v145_v5 }
  0x3d   : > { %v195_v22 = vadd.f32 %v194_v18, %v131_v13  ;;  %v330_v24 = vadd.f32 %v329_v20, %v267_v15  ;;  %v147_v13 = vld [vmem:[%s478_s12 + $0x128] sm:$0xff]  ;;  %v283_v15 = vmul.f32 %v146_v9, %v146_v9 }
  0x3f   : > { %v196_v26 = vadd.f32 %v195_v22, %v132_v17  ;;  %v331_v28 = vadd.f32 %v330_v24, %v268_v19  ;;  %v148_v17 = vld [vmem:[%s478_s12 + $0x130] sm:$0xff]  ;;  %v284_v19 = vmul.f32 %v147_v13, %v147_v13 }
  0x41   : > { %v197_v30 = vadd.f32 %v196_v26, %v133_v21  ;;  %v332_v32 = vadd.f32 %v331_v28, %v269_v23  ;;  %v149_v21 = vld [vmem:[%s478_s12 + $0x138] sm:$0xff]  ;;  %v285_v23 = vmul.f32 %v148_v17, %v148_v17 }
  0x43   : > { %v198_v34 = vadd.f32 %v197_v30, %v134_v25  ;;  %v333_v36 = vadd.f32 %v332_v32, %v270_v27  ;;  %v150_v25 = vld [vmem:[%s478_s12 + $0x140] sm:$0xff]  ;;  %v286_v27 = vmul.f32 %v149_v21, %v149_v21 }
  0x45   : > { %v199_v38 = vadd.f32 %v198_v34, %v135_v29  ;;  %v334_v40 = vadd.f32 %v333_v36, %v271_v31  ;;  %v151_v29 = vld [vmem:[%s478_s12 + $0x148] sm:$0xff]  ;;  %v287_v31 = vmul.f32 %v150_v25, %v150_v25 }
  0x47   : > { %v200_v42 = vadd.f32 %v199_v38, %v136_v33  ;;  %v335_v44 = vadd.f32 %v334_v40, %v272_v35  ;;  %v152_v33 = vld [vmem:[%s478_s12 + $0x150] sm:$0xff]  ;;  %v288_v35 = vmul.f32 %v151_v29, %v151_v29 }
  0x49   : > { %v201_v46 = vadd.f32 %v200_v42, %v137_v37  ;;  %v336_v48 = vadd.f32 %v335_v44, %v273_v39  ;;  %v153_v37 = vld [vmem:[%s478_s12 + $0x158] sm:$0xff]  ;;  %v289_v39 = vmul.f32 %v152_v33, %v152_v33 }
  0x4b   : > { %v202_v50 = vadd.f32 %v201_v46, %v138_v41  ;;  %v337_v52 = vadd.f32 %v336_v48, %v274_v43  ;;  %v154_v41 = vld [vmem:[%s478_s12 + $0x160] sm:$0xff]  ;;  %v290_v43 = vmul.f32 %v153_v37, %v153_v37 }
  0x4d   : > { %v203_v54 = vadd.f32 %v202_v50, %v139_v45  ;;  %v338_v56 = vadd.f32 %v337_v52, %v275_v47  ;;  %v155_v45 = vld [vmem:[%s478_s12 + $0x168] sm:$0xff]  ;;  %v291_v47 = vmul.f32 %v154_v41, %v154_v41 }
  0x4f   : > { %v204_v58 = vadd.f32 %v203_v54, %v140_v49  ;;  %v339_v60 = vadd.f32 %v338_v56, %v276_v51  ;;  %v156_v49 = vld [vmem:[%s478_s12 + $0x170] sm:$0xff]  ;;  %v292_v51 = vmul.f32 %v155_v45, %v155_v45 }
  0x51   : > { %v205_v62 = vadd.f32 %v204_v58, %v141_v53  ;;  %v340_v0 = vadd.f32 %v339_v60, %v277_v55  ;;  %v157_v53 = vld [vmem:[%s478_s12 + $0x178] sm:$0xff]  ;;  %v293_v55 = vmul.f32 %v156_v49, %v156_v49 }
  0x53   : > { %v206_v2 = vadd.f32 %v205_v62, %v142_v57  ;;  %v341_v4 = vadd.f32 %v340_v0, %v278_v59  ;;  %v158_v57 = vld [vmem:[%s478_s12 + $0x180] sm:$0xff]  ;;  %v294_v59 = vmul.f32 %v157_v53, %v157_v53 }
  0x55   : > { %v207_v6 = vadd.f32 %v206_v2, %v143_v61  ;;  %v342_v8 = vadd.f32 %v341_v4, %v279_v63  ;;  %v159_v61 = vld [vmem:[%s478_s12 + $0x188] sm:$0xff]  ;;  %v295_v63 = vmul.f32 %v158_v57, %v158_v57 }
  0x57   : > { %v208_v10 = vadd.f32 %v207_v6, %v144_v1  ;;  %v343_v12 = vadd.f32 %v342_v8, %v280_v3  ;;  %v160_v1 = vld [vmem:[%s478_s12 + $0x190] sm:$0xff]  ;;  %v296_v3 = vmul.f32 %v159_v61, %v159_v61 }
  0x59   : > { %v209_v14 = vadd.f32 %v208_v10, %v145_v5  ;;  %v344_v16 = vadd.f32 %v343_v12, %v281_v7  ;;  %v161_v5 = vld [vmem:[%s478_s12 + $0x198] sm:$0xff]  ;;  %v297_v7 = vmul.f32 %v160_v1, %v160_v1 }
  0x5b   : > { %v210_v18 = vadd.f32 %v209_v14, %v146_v9  ;;  %v345_v20 = vadd.f32 %v344_v16, %v282_v11  ;;  %v162_v9 = vld [vmem:[%s478_s12 + $0x1a0] sm:$0xff]  ;;  %v298_v11 = vmul.f32 %v161_v5, %v161_v5 }
  0x5d   : > { %v211_v22 = vadd.f32 %v210_v18, %v147_v13  ;;  %v346_v24 = vadd.f32 %v345_v20, %v283_v15  ;;  %v163_v13 = vld [vmem:[%s478_s12 + $0x1a8] sm:$0xff]  ;;  %v299_v15 = vmul.f32 %v162_v9, %v162_v9 }
  0x5f   : > { %v212_v26 = vadd.f32 %v211_v22, %v148_v17  ;;  %v347_v28 = vadd.f32 %v346_v24, %v284_v19  ;;  %v164_v17 = vld [vmem:[%s478_s12 + $0x1b0] sm:$0xff]  ;;  %v300_v19 = vmul.f32 %v163_v13, %v163_v13 }
  0x61   : > { %v213_v30 = vadd.f32 %v212_v26, %v149_v21  ;;  %v348_v32 = vadd.f32 %v347_v28, %v285_v23  ;;  %v165_v21 = vld [vmem:[%s478_s12 + $0x1b8] sm:$0xff]  ;;  %v301_v23 = vmul.f32 %v164_v17, %v164_v17 }
  0x63   : > { %v214_v34 = vadd.f32 %v213_v30, %v150_v25  ;;  %v349_v36 = vadd.f32 %v348_v32, %v286_v27  ;;  %v166_v25 = vld [vmem:[%s478_s12 + $0x1c0] sm:$0xff]  ;;  %v302_v27 = vmul.f32 %v165_v21, %v165_v21 }
  0x65   : > { %v215_v38 = vadd.f32 %v214_v34, %v151_v29  ;;  %v350_v40 = vadd.f32 %v349_v36, %v287_v31  ;;  %v167_v29 = vld [vmem:[%s478_s12 + $0x1c8] sm:$0xff]  ;;  %v303_v31 = vmul.f32 %v166_v25, %v166_v25 }
  0x67   : > { %v216_v42 = vadd.f32 %v215_v38, %v152_v33  ;;  %v351_v44 = vadd.f32 %v350_v40, %v288_v35  ;;  %v168_v33 = vld [vmem:[%s478_s12 + $0x1d0] sm:$0xff]  ;;  %v304_v35 = vmul.f32 %v167_v29, %v167_v29 }
  0x69   : > { %v217_v46 = vadd.f32 %v216_v42, %v153_v37  ;;  %v352_v48 = vadd.f32 %v351_v44, %v289_v39  ;;  %v169_v37 = vld [vmem:[%s478_s12 + $0x1d8] sm:$0xff]  ;;  %v305_v39 = vmul.f32 %v168_v33, %v168_v33 }
  0x6b   : > { %v218_v50 = vadd.f32 %v217_v46, %v154_v41  ;;  %v353_v52 = vadd.f32 %v352_v48, %v290_v43  ;;  %v170_v41 = vld [vmem:[%s478_s12 + $0x1e0] sm:$0xff]  ;;  %v306_v43 = vmul.f32 %v169_v37, %v169_v37 }
  0x6d   : > { %v219_v54 = vadd.f32 %v218_v50, %v155_v45  ;;  %v354_v56 = vadd.f32 %v353_v52, %v291_v47  ;;  %v171_v45 = vld [vmem:[%s478_s12 + $0x1e8] sm:$0xff]  ;;  %v307_v47 = vmul.f32 %v170_v41, %v170_v41 }
  0x6f   : > { %v220_v58 = vadd.f32 %v219_v54, %v156_v49  ;;  %v355_v60 = vadd.f32 %v354_v56, %v292_v51  ;;  %v172_v49 = vld [vmem:[%s478_s12 + $0x1f0] sm:$0xff]  ;;  %v308_v51 = vmul.f32 %v171_v45, %v171_v45 }
  0x71   : > { %v221_v62 = vadd.f32 %v220_v58, %v157_v53  ;;  %v356_v0 = vadd.f32 %v355_v60, %v293_v55  ;;  %v173_v53 = vld [vmem:[%s478_s12 + $0x1f8] sm:$0xff]  ;;  %v309_v55 = vmul.f32 %v172_v49, %v172_v49 }
  0x72   : > { %v310_v58 = vmul.f32 %v173_v53, %v173_v53 }
  0x73   : > { %v222_v2 = vadd.f32 %v221_v62, %v158_v57  ;;  %v357_v4 = vadd.f32 %v356_v0, %v294_v59 }
  0x75   : > { %v223_v6 = vadd.f32 %v222_v2, %v159_v61  ;;  %v358_v8 = vadd.f32 %v357_v4, %v295_v63 }
  0x77   : > { %v224_v10 = vadd.f32 %v223_v6, %v160_v1  ;;  %v359_v12 = vadd.f32 %v358_v8, %v296_v3 }
  0x79   : > { %v225_v14 = vadd.f32 %v224_v10, %v161_v5  ;;  %v360_v16 = vadd.f32 %v359_v12, %v297_v7  ;;  %v174_v7 = vld [vmem:[#allocation2] sm:$0x1]  ;;  %v246_v12 = vld [vmem:[#allocation3] sm:$0x1] }
  0x7b   : > { %v226_v18 = vadd.f32 %v225_v14, %v162_v9  ;;  %v361_v20 = vadd.f32 %v360_v16, %v298_v11 }
  0x7d   : > { %v227_v22 = vadd.f32 %v226_v18, %v163_v13  ;;  %v362_v24 = vadd.f32 %v361_v20, %v299_v15 }
  0x7f   : > { %v228_v26 = vadd.f32 %v227_v22, %v164_v17  ;;  %v363_v28 = vadd.f32 %v362_v24, %v300_v19 }
  0x81   : > { %v229_v30 = vadd.f32 %v228_v26, %v165_v21  ;;  %v364_v32 = vadd.f32 %v363_v28, %v301_v23 }
  0x83   : > { %v230_v34 = vadd.f32 %v229_v30, %v166_v25  ;;  %v365_v36 = vadd.f32 %v364_v32, %v302_v27 }
  0x85   : > { %v231_v38 = vadd.f32 %v230_v34, %v167_v29  ;;  %v366_v40 = vadd.f32 %v365_v36, %v303_v31 }
  0x87   : > { %v232_v42 = vadd.f32 %v231_v38, %v168_v33  ;;  %v367_v44 = vadd.f32 %v366_v40, %v304_v35 }
  0x89   : > { %v233_v46 = vadd.f32 %v232_v42, %v169_v37  ;;  %v368_v48 = vadd.f32 %v367_v44, %v305_v39 }
  0x8b   : > { %v234_v50 = vadd.f32 %v233_v46, %v170_v41  ;;  %v369_v52 = vadd.f32 %v368_v48, %v306_v43 }
  0x8d   : > { %v235_v54 = vadd.f32 %v234_v50, %v171_v45  ;;  %v370_v56 = vadd.f32 %v369_v52, %v307_v47 }
  0x8f   : > { %v236_v57 = vadd.f32 %v235_v54, %v172_v49  ;;  %v371_v59 = vadd.f32 %v370_v56, %v308_v51 }
  0x91   : > { %v237_v60 = vadd.f32 %v236_v57, %v173_v53  ;;  %v372_v61 = vadd.f32 %v371_v59, %v309_v55 }
  0x93   : > { %v238_v62 = vrot.slane %v237_v60, 4  ;;  %v373_v63 = vadd.f32 %v372_v61, %v310_v58 }
  0x95   : > { %v239_v0 = vadd.f32 %v238_v62, %v237_v60  ;;  %v374_v1 = vrot.slane %v373_v63, 4 }
  0x97   : > { %v240_v2 = vrot.slane %v239_v0, 2  ;;  %v375_v3 = vadd.f32 %v374_v1, %v373_v63 }
  0x99   : > { %v241_v4 = vadd.f32 %v240_v2, %v239_v0  ;;  %v376_v5 = vrot.slane %v375_v3, 2 }
  0x9b   : > { %v242_v6 = vrot.slane %v241_v4, 1  ;;  %v377_v8 = vadd.f32 %v376_v5, %v375_v3 }
  0x9d   : > { %v243_v9 = vadd.f32 %v242_v6, %v241_v4  ;;  %v378_v10 = vrot.slane %v377_v8, 1  ;;  %385 = sbr.rel (%p432_p5) target bundleno = 173 (0xad), region = 32 }
  0x9f   : > { %v244_v11 = vadd.f32 %v243_v9, %v174_v7  ;;  %v379_v13 = vadd.f32 %v378_v10, %v377_v8 }
  0xa1   : > { %245 = vst [vmem:[#allocation2] sm:$0x1] %v244_v11  ;;  %v380_v14 = vadd.f32 %v379_v13, %v246_v12 }
  0xa3   : > { %381 = vst [vmem:[#allocation3] sm:$0x1] %v380_v14 }
  0xa8   : > { %v386_v15 = vld [vmem:[#allocation2] sm:$0x1] }
  0xaa   : > { %v433_v16 = vld [vmem:[#allocation3] ss:$0 sm:$0xff] }
  0xab   : > { %v395_v17 = vsel %vm394_vm0, %v386_v15, %v433_v16 }
  0xac   : > { %396 = vst [vmem:[%s553_s1] sm:$0x3] %v395_v17 }
  0xad PF: > { %s11_s6 = sadd.s32 1, %s451_s6  }
  0xae   : > { %p8_p6 = scmp.ge.s32.totalorder %s11_s6, 4  }
  0xb0   :  { %10 = sbr.rel (!%p8_p6) target bundleno = 1 (0x1), region = 58 }

// kernel: basic_conv_forward.5
= control target key start
LH: loop header
LB: loop body
LE: loop exit
PB: predicated region body
PF: predicated region fallthrough
CT: control target
= control target key end

     0   :  { %s613_s12 = smov 0   ;;  %s1122_s0 = inlined_call_operand.vmem [shape: f32[1024,128], index: 0, kind: input, shape index: {}, may-alias: {0,3}]   ;;  %s1123_s1 = inlined_call_operand.vmem [shape: f32[1,128], index: 1, kind: input, shape index: {}]   ;;  %s1124_s2 = inlined_call_operand.vmem [shape: f32[1,128], index: 2, kind: input, shape index: {}]   ;;  %s1125_s3 = inlined_call_operand.vmem [shape: f32[1024,128], index: 3, kind: output, shape index: {}, may-alias: {0,3}]  }
   0x1 LB: > { %s564_s13 = sadd.s32 4294967295, %s591_s12   ;;  %p568_p0 = scmp.ge.s32.totalorder %s591_s12, 1  ;;  %s591_s12 = sphi %s613_s12, %s13_s12  }
   0x2   : > { %p138_p1 = scmp.lt.s32.totalorder %s591_s12, 3 }
   0x4   : > { %p139_p2 = pnand %p568_p0, %p138_p1 }
   0x6   : > { %142 = sbr.rel (%p139_p2) target bundleno = 75 (0x4b), region = 32 }
   0xd   : > { %s569_s14 = sshll.u32 %s564_s13, 6  ;;  %v627_v0 = vld [vmem:[%s1123_s1] ss:$0 sm:$0xff] }
   0xe   : > { %p163_p3 = scmp.lt.s32.totalorder %s569_s14, 127  ;;  %v639_v1 = vld [vmem:[%s1124_s2] ss:$0 sm:$0xff] }
  0x10   : > { %s1167_s14 = smov (!%p163_p3, %s569_s14), 127 }
  0x11   : > { %s570_s15 = sshll.u32 %s1167_s14, 3 }
  0x12   : > { %s634_s20 = scalar_lea.vmem %s1122_s0, %s570_s15  ;;  %s798_s25 = scalar_lea.vmem %s1125_s3, %s570_s15 }
  0x13   : > { %v174_v2 = vld [vmem:[%s634_s20] sm:$0xff]  ;;  %v175_v3 = vld [vmem:[%s634_s20 + $0x8] sm:$0xff]  ;;  %v176_v4 = vld [vmem:[%s634_s20 + $0x10] sm:$0xff] }
  0x14   : > { %v177_v5 = vld [vmem:[%s634_s20 + $0x18] sm:$0xff]  ;;  %v178_v6 = vld [vmem:[%s634_s20 + $0x20] sm:$0xff]  ;;  %v179_v7 = vld [vmem:[%s634_s20 + $0x28] sm:$0xff]  ;;  %v245_v8 = vmul.f32 %v627_v0, %v174_v2  ;;  %v246_v9 = vmul.f32 %v627_v0, %v175_v3  ;;  %v247_v10 = vmul.f32 %v627_v0, %v176_v4 }
  0x15   : > { %v180_v11 = vld [vmem:[%s634_s20 + $0x30] sm:$0xff]  ;;  %v181_v12 = vld [vmem:[%s634_s20 + $0x38] sm:$0xff]  ;;  %v248_v13 = vmul.f32 %v627_v0, %v177_v5  ;;  %v249_v14 = vmul.f32 %v627_v0, %v178_v6  ;;  %v250_v15 = vmul.f32 %v627_v0, %v179_v7  ;;  %v182_v20 = vld [vmem:[%s634_s20 + $0x40] sm:$0xff] }
  0x16   : > { %v656_v16 = vadd.f32 %v639_v1, %v245_v8  ;;  %v659_v17 = vadd.f32 %v639_v1, %v246_v9  ;;  %v662_v18 = vadd.f32 %v639_v1, %v247_v10  ;;  %v251_v19 = vmul.f32 %v627_v0, %v180_v11  ;;  %v183_v21 = vld [vmem:[%s634_s20 + $0x48] sm:$0xff]  ;;  %v184_v22 = vld [vmem:[%s634_s20 + $0x50] sm:$0xff]  ;;  %v185_v27 = vld [vmem:[%s634_s20 + $0x58] sm:$0xff] }
  0x17   : > { %v669_v23 = vadd.f32 %v639_v1, %v248_v13  ;;  %v672_v24 = vadd.f32 %v639_v1, %v249_v14  ;;  %v675_v25 = vadd.f32 %v639_v1, %v250_v15  ;;  %v252_v26 = vmul.f32 %v627_v0, %v181_v12  ;;  %v186_v28 = vld [vmem:[%s634_s20 + $0x60] sm:$0xff]  ;;  %v187_v29 = vld [vmem:[%s634_s20 + $0x68] sm:$0xff]  ;;  %v188_v34 = vld [vmem:[%s634_s20 + $0x70] sm:$0xff] }
  0x18   : > { %v685_v33 = vadd.f32 %v639_v1, %v251_v19  ;;  %v189_v39 = vld [vmem:[%s634_s20 + $0x78] sm:$0xff]  ;;  %v253_v41 = vmul.f32 %v627_v0, %v182_v20  ;;  %v254_v42 = vmul.f32 %v627_v0, %v183_v21  ;;  %v255_v43 = vmul.f32 %v627_v0, %v184_v22  ;;  %v190_v52 = vld [vmem:[%s634_s20 + $0x80] sm:$0xff]  ;;  %v191_v53 = vld [vmem:[%s634_s20 + $0x88] sm:$0xff] }
  0x19   : > { %v692_v38 = vadd.f32 %v639_v1, %v252_v26  ;;  %v256_v45 = vmul.f32 %v627_v0, %v185_v27  ;;  %v257_v46 = vmul.f32 %v627_v0, %v186_v28  ;;  %v258_v47 = vmul.f32 %v627_v0, %v187_v29  ;;  %v192_v54 = vld [vmem:[%s634_s20 + $0x90] sm:$0xff]  ;;  %v193_v59 = vld [vmem:[%s634_s20 + $0x98] sm:$0xff]  ;;  %v194_v60 = vld [vmem:[%s634_s20 + $0xa0] sm:$0xff] }
  0x1a   : > { %v704_v48 = vadd.f32 %v639_v1, %v253_v41  ;;  %v707_v49 = vadd.f32 %v639_v1, %v254_v42  ;;  %v710_v50 = vadd.f32 %v639_v1, %v255_v43  ;;  %v259_v51 = vmul.f32 %v627_v0, %v188_v34  ;;  %v195_v61 = vld [vmem:[%s634_s20 + $0xa8] sm:$0xff]  ;;  %v196_v4 = vld [vmem:[%s634_s20 + $0xb0] sm:$0xff]  ;;  %v197_v9 = vld [vmem:[%s634_s20 + $0xb8] sm:$0xff] }
  0x1b   : > { %v717_v55 = vadd.f32 %v639_v1, %v256_v45  ;;  %v720_v56 = vadd.f32 %v639_v1, %v257_v46  ;;  %v723_v57 = vadd.f32 %v639_v1, %v258_v47  ;;  %v260_v58 = vmul.f32 %v627_v0, %v189_v39  ;;  %v198_v28 = vld [vmem:[%s634_s20 + $0xc0] sm:$0xff]  ;;  %v199_v29 = vld [vmem:[%s634_s20 + $0xc8] sm:$0xff]  ;;  %v200_v34 = vld [vmem:[%s634_s20 + $0xd0] sm:$0xff] }
  0x1c   : > { %v733_v3 = vadd.f32 %v639_v1, %v259_v51  ;;  %v261_v11 = vmul.f32 %v627_v0, %v190_v52  ;;  %v262_v12 = vmul.f32 %v627_v0, %v191_v53  ;;  %v263_v13 = vmul.f32 %v627_v0, %v192_v54  ;;  %v201_v45 = vld [vmem:[%s634_s20 + $0xd8] sm:$0xff]  ;;  %v202_v46 = vld [vmem:[%s634_s20 + $0xe0] sm:$0xff]  ;;  %v203_v47 = vld [vmem:[%s634_s20 + $0xe8] sm:$0xff] }
  0x1d   : > { %v740_v8 = vadd.f32 %v639_v1, %v260_v58  ;;  %v264_v15 = vmul.f32 %v627_v0, %v193_v59  ;;  %v265_v19 = vmul.f32 %v627_v0, %v194_v60  ;;  %v266_v20 = vmul.f32 %v627_v0, %v195_v61  ;;  %v204_v58 = vld [vmem:[%s634_s20 + $0xf0] sm:$0xff]  ;;  %v785_v59 = vld [vmem:[%s634_s20 + $0xf8] sm:$0xff]  ;;  %v828_v61 = vld [vmem:[%s634_s20 + $0x148] sm:$0xff] }
  0x1e   : > { %v752_v21 = vadd.f32 %v639_v1, %v261_v11  ;;  %v755_v22 = vadd.f32 %v639_v1, %v262_v12  ;;  %v758_v26 = vadd.f32 %v639_v1, %v263_v13  ;;  %v267_v27 = vmul.f32 %v627_v0, %v196_v4  ;;  %v801_v11 = vld [vmem:[%s634_s20 + $0x100] sm:$0xff]  ;;  %v804_v12 = vld [vmem:[%s634_s20 + $0x108] sm:$0xff]  ;;  %v807_v13 = vld [vmem:[%s634_s20 + $0x110] sm:$0xff] }
  0x1f   : > { %v765_v39 = vadd.f32 %v639_v1, %v264_v15  ;;  %v768_v41 = vadd.f32 %v639_v1, %v265_v19  ;;  %v771_v42 = vadd.f32 %v639_v1, %v266_v20  ;;  %v268_v43 = vmul.f32 %v627_v0, %v197_v9  ;;  %v810_v15 = vld [vmem:[%s634_s20 + $0x118] sm:$0xff]  ;;  %v813_v19 = vld [vmem:[%s634_s20 + $0x120] sm:$0xff]  ;;  %v816_v20 = vld [vmem:[%s634_s20 + $0x128] sm:$0xff] }
  0x20   : > { %v781_v54 = vadd.f32 %v639_v1, %v267_v27  ;;  %v819_v27 = vld [vmem:[%s634_s20 + $0x130] sm:$0xff]  ;;  %v825_v4 = vld [vmem:[%s634_s20 + $0x140] sm:$0xff]  ;;  %v834_v53 = vld [vmem:[%s634_s20 + $0x158] sm:$0xff]  ;;  %v269_v32 = vmul.f32 %v627_v0, %v198_v28  ;;  %v270_v31 = vmul.f32 %v627_v0, %v199_v29  ;;  %v271_v30 = vmul.f32 %v627_v0, %v200_v34 }
  0x21   : > { %v791_v9 = vadd.f32 %v639_v1, %v268_v43  ;;  %v822_v43 = vld [vmem:[%s634_s20 + $0x138] sm:$0xff]  ;;  %v831_v60 = vld [vmem:[%s634_s20 + $0x150] sm:$0xff]  ;;  %v837_v52 = vld [vmem:[%s634_s20 + $0x160] sm:$0xff]  ;;  %v272_v28 = vmul.f32 %v627_v0, %v201_v45  ;;  %v273_v29 = vmul.f32 %v627_v0, %v202_v46  ;;  %v274_v34 = vmul.f32 %v627_v0, %v203_v47 }
  0x22   : > { %v840_v51 = vld [vmem:[%s634_s20 + $0x168] sm:$0xff]  ;;  %v843_v14 = vld [vmem:[%s634_s20 + $0x170] sm:$0xff]  ;;  %v846_v10 = vld [vmem:[%s634_s20 + $0x178] sm:$0xff]  ;;  %v402_v35 = vmax.f32 %v781_v54, 0.0  ;;  %v341_v45 = vadd.f32 %v639_v1, %v270_v31  ;;  %v342_v46 = vadd.f32 %v639_v1, %v271_v30  ;;  %v275_v47 = vmul.f32 %v627_v0, %v204_v58 }
  0x23   : > { %v849_v7 = vld [vmem:[%s634_s20 + $0x180] sm:$0xff]  ;;  %v852_v6 = vld [vmem:[%s634_s20 + $0x188] sm:$0xff]  ;;  %v855_v5 = vld [vmem:[%s634_s20 + $0x190] sm:$0xff]  ;;  %v1138_v31 = vmax.f32 %v669_v23, 0.0  ;;  %v1139_v30 = vmax.f32 %v672_v24, 0.0  ;;  %v1143_v23 = vmax.f32 %v704_v48, 0.0 }
  0x24   : > { %v858_v2 = vld [vmem:[%s634_s20 + $0x198] sm:$0xff]  ;;  %v861_v63 = vld [vmem:[%s634_s20 + $0x1a0] sm:$0xff]  ;;  %v864_v62 = vld [vmem:[%s634_s20 + $0x1a8] sm:$0xff]  ;;  %v1144_v24 = vmax.f32 %v707_v49, 0.0  ;;  %v1151_v48 = vmax.f32 %v752_v21, 0.0  ;;  %v1152_v49 = vmax.f32 %v755_v22, 0.0  ;;  %v345_v21 = vadd.f32 %v639_v1, %v274_v34 }
  0x25   : > { %1126 = vst [vmem:[#allocation2_spill] sm:$0xff] %v864_v62  ;;  %v867_v44 = vld [vmem:[%s634_s20 + $0x1b0] sm:$0xff]  ;;  %v870_v40 = vld [vmem:[%s634_s20 + $0x1b8] sm:$0xff]  ;;  %v873_v37 = vld [vmem:[%s634_s20 + $0x1c0] sm:$0xff]  ;;  %v276_v22 = vmul.f32 %v627_v0, %v785_v59  ;;  %v277_v59 = vmul.f32 %v627_v0, %v801_v11  ;;  %v278_v34 = vmul.f32 %v627_v0, %v804_v12 }
  0x26   : > { %1127 = vst [vmem:[#allocation3_spill] sm:$0xff] %v867_v44  ;;  %1128 = vst [vmem:[#allocation4_spill] sm:$0xff] %v870_v40  ;;  %v876_v36 = vld [vmem:[%s634_s20 + $0x1c8] sm:$0xff]  ;;  %v883_v62 = vld [vmem:[%s634_s20 + $0x1d0] sm:$0xff] }
  0x27   : > { %1129 = vst [vmem:[#allocation5_spill] sm:$0xff] %v876_v36  ;;  %v886_v44 = vld [vmem:[%s634_s20 + $0x1d8] sm:$0xff]  ;;  %v889_v40 = vld [vmem:[%s634_s20 + $0x1e0] sm:$0xff]  ;;  %v403_v36 = vmax.f32 %v791_v9, 0.0  ;;  %v896_v54 = vld [vmem:[%s634_s20 + $0x1e8] sm:$0xff]  ;;  %v340_v9 = vadd.f32 %v639_v1, %v269_v32  ;;  %v1145_v32 = vmax.f32 %v710_v50, 0.0  ;;  %v348_v11 = vadd.f32 %v639_v1, %v277_v59 }
  0x28   : > { %1130 = vst [vmem:[#allocation6_spill] sm:$0xff] %v886_v44  ;;  %1131 = vst [vmem:[#allocation7_spill] sm:$0xff] %v889_v40  ;;  %v899_v44 = vld [vmem:[%s634_s20 + $0x1f0] sm:$0xff]  ;;  %v902_v40 = vld [vmem:[%s634_s20 + $0x1f8] sm:$0xff]  ;;  %v1153_v50 = vmax.f32 %v758_v26, 0.0  ;;  %v349_v12 = vadd.f32 %v639_v1, %v278_v34 }
  0x29   : > { %1132 = vst [vmem:[#allocation8_spill] sm:$0xff] %v896_v54  ;;  %1133 = vst [vmem:[#allocation9_spill] sm:$0xff] %v899_v44  ;;  %v1135_v54 = vmax.f32 %v656_v16, 0.0  ;;  %v1136_v44 = vmax.f32 %v659_v17, 0.0  ;;  %v1140_v16 = vmax.f32 %v675_v25, 0.0  ;;  %v1141_v17 = vmax.f32 %v685_v33, 0.0 }
  0x2a   : > { %1134 = vst [vmem:[#allocation10_spill] sm:$0xff] %v902_v40  ;;  %v1137_v40 = vmax.f32 %v662_v18, 0.0  ;;  %447 = vst [vmem:[%s798_s25 + $0x18] sm:$0xff] %v1138_v31  ;;  %v1142_v18 = vmax.f32 %v692_v38, 0.0  ;;  %v1146_v25 = vmax.f32 %v717_v55, 0.0  ;;  %v1147_v33 = vmax.f32 %v720_v56, 0.0 }
  0x2b   : > { %444 = vst [vmem:[%s798_s25] sm:$0xff] %v1135_v54  ;;  %445 = vst [vmem:[%s798_s25 + $0x8] sm:$0xff] %v1136_v44  ;;  %v1148_v38 = vmax.f32 %v723_v57, 0.0  ;;  %v1150_v44 = vmax.f32 %v740_v8, 0.0  ;;  %v1154_v55 = vmax.f32 %v765_v39, 0.0  ;;  %v1155_v56 = vmax.f32 %v768_v41, 0.0 }
  0x2c   : > { %446 = vst [vmem:[%s798_s25 + $0x10] sm:$0xff] %v1137_v40  ;;  %448 = vst [vmem:[%s798_s25 + $0x20] sm:$0xff] %v1139_v30  ;;  %v1149_v40 = vmax.f32 %v733_v3, 0.0  ;;  %v1156_v57 = vmax.f32 %v771_v42, 0.0  ;;  %v343_v3 = vadd.f32 %v639_v1, %v272_v28  ;;  %v344_v8 = vadd.f32 %v639_v1, %v273_v29 }
  0x2d   : > { %449 = vst [vmem:[%s798_s25 + $0x28] sm:$0xff] %v1140_v16  ;;  %450 = vst [vmem:[%s798_s25 + $0x30] sm:$0xff] %v1141_v17  ;;  %v404_v26 = vmax.f32 %v340_v9, 0.0  ;;  %v405_v39 = vmax.f32 %v341_v45, 0.0  ;;  %v406_v41 = vmax.f32 %v342_v46, 0.0  ;;  %v346_v42 = vadd.f32 %v639_v1, %v275_v47  ;;  %v1158_v34 = vld [vmem:[#allocation3_spill] sm:$0xff] }
  0x2e   : > { %451 = vst [vmem:[%s798_s25 + $0x38] sm:$0xff] %v1142_v18  ;;  %452 = vst [vmem:[%s798_s25 + $0x40] sm:$0xff] %v1143_v23  ;;  %v408_v58 = vmax.f32 %v344_v8, 0.0  ;;  %v347_v28 = vadd.f32 %v639_v1, %v276_v22  ;;  %v279_v54 = vmul.f32 %v627_v0, %v807_v13  ;;  %v280_v45 = vmul.f32 %v627_v0, %v810_v15 }
  0x2f   : > { %453 = vst [vmem:[%s798_s25 + $0x48] sm:$0xff] %v1144_v24  ;;  %454 = vst [vmem:[%s798_s25 + $0x50] sm:$0xff] %v1145_v32  ;;  %v410_v29 = vmax.f32 %v346_v42, 0.0  ;;  %v281_v46 = vmul.f32 %v627_v0, %v813_v19  ;;  %v282_v47 = vmul.f32 %v627_v0, %v816_v20  ;;  %v283_v31 = vmul.f32 %v627_v0, %v819_v27 }
  0x30   : > { %455 = vst [vmem:[%s798_s25 + $0x58] sm:$0xff] %v1146_v25  ;;  %456 = vst [vmem:[%s798_s25 + $0x60] sm:$0xff] %v1147_v33  ;;  %v411_v9 = vmax.f32 %v347_v28, 0.0  ;;  %v350_v13 = vadd.f32 %v639_v1, %v279_v54  ;;  %v351_v15 = vadd.f32 %v639_v1, %v280_v45  ;;  %v284_v30 = vmul.f32 %v627_v0, %v822_v43  ;;  %v1159_v45 = vld [vmem:[#allocation4_spill] sm:$0xff] }
  0x31   : > { %457 = vst [vmem:[%s798_s25 + $0x68] sm:$0xff] %v1148_v38  ;;  %458 = vst [vmem:[%s798_s25 + $0x70] sm:$0xff] %v1149_v40  ;;  %v352_v19 = vadd.f32 %v639_v1, %v281_v46  ;;  %v353_v20 = vadd.f32 %v639_v1, %v282_v47  ;;  %v412_v16 = vmax.f32 %v348_v11, 0.0  ;;  %v413_v17 = vmax.f32 %v349_v12, 0.0 }
  0x32   : > { %459 = vst [vmem:[%s798_s25 + $0x78] sm:$0xff] %v1150_v44  ;;  %460 = vst [vmem:[%s798_s25 + $0x80] sm:$0xff] %v1151_v48  ;;  %v414_v18 = vmax.f32 %v350_v13, 0.0  ;;  %v354_v23 = vadd.f32 %v639_v1, %v283_v31  ;;  %v415_v27 = vmax.f32 %v351_v15, 0.0  ;;  %v355_v25 = vadd.f32 %v639_v1, %v284_v30 }
  0x33   : > { %461 = vst [vmem:[%s798_s25 + $0x88] sm:$0xff] %v1152_v49  ;;  %462 = vst [vmem:[%s798_s25 + $0x90] sm:$0xff] %v1153_v50  ;;  %v416_v24 = vmax.f32 %v352_v19, 0.0  ;;  %v417_v32 = vmax.f32 %v353_v20, 0.0  ;;  %v285_v43 = vmul.f32 %v627_v0, %v825_v4  ;;  %v286_v38 = vmul.f32 %v627_v0, %v828_v61 }
  0x34   : > { %463 = vst [vmem:[%s798_s25 + $0x98] sm:$0xff] %v1154_v55  ;;  %464 = vst [vmem:[%s798_s25 + $0xa0] sm:$0xff] %v1155_v56  ;;  %v418_v33 = vmax.f32 %v354_v23, 0.0  ;;  %v287_v40 = vmul.f32 %v627_v0, %v831_v60  ;;  %v419_v44 = vmax.f32 %v355_v25, 0.0  ;;  %v288_v48 = vmul.f32 %v627_v0, %v834_v53  ;;  %v1162_v25 = vld [vmem:[#allocation7_spill] sm:$0xff] }
  0x35   : > { %465 = vst [vmem:[%s798_s25 + $0xa8] sm:$0xff] %v1156_v57  ;;  %466 = vst [vmem:[%s798_s25 + $0xb0] sm:$0xff] %v402_v35  ;;  %v407_v35 = vmax.f32 %v343_v3, 0.0  ;;  %v289_v49 = vmul.f32 %v627_v0, %v837_v52  ;;  %v290_v50 = vmul.f32 %v627_v0, %v840_v51  ;;  %v356_v4 = vadd.f32 %v639_v1, %v285_v43  ;;  %v1163_v43 = vld [vmem:[#allocation8_spill] sm:$0xff] }
  0x36   : > { %467 = vst [vmem:[%s798_s25 + $0xb8] sm:$0xff] %v403_v36  ;;  %v409_v36 = vmax.f32 %v345_v21, 0.0  ;;  %468 = vst [vmem:[%s798_s25 + $0xc0] sm:$0xff] %v404_v26  ;;  %v357_v61 = vadd.f32 %v639_v1, %v286_v38  ;;  %v358_v60 = vadd.f32 %v639_v1, %v287_v40  ;;  %v291_v55 = vmul.f32 %v627_v0, %v843_v14 }
  0x37   : > { %469 = vst [vmem:[%s798_s25 + $0xc8] sm:$0xff] %v405_v39  ;;  %470 = vst [vmem:[%s798_s25 + $0xd0] sm:$0xff] %v406_v41  ;;  %v359_v53 = vadd.f32 %v639_v1, %v288_v48  ;;  %v360_v52 = vadd.f32 %v639_v1, %v289_v49  ;;  %v361_v51 = vadd.f32 %v639_v1, %v290_v50  ;;  %v420_v57 = vmax.f32 %v356_v4, 0.0 }
  0x38   : > { %471 = vst [vmem:[%s798_s25 + $0xd8] sm:$0xff] %v407_v35  ;;  %472 = vst [vmem:[%s798_s25 + $0xe0] sm:$0xff] %v408_v58  ;;  %v292_v56 = vmul.f32 %v627_v0, %v846_v10  ;;  %v421_v3 = vmax.f32 %v357_v61, 0.0  ;;  %v422_v8 = vmax.f32 %v358_v60, 0.0  ;;  %v362_v21 = vadd.f32 %v639_v1, %v291_v55  ;;  %v1165_v61 = vld [vmem:[#allocation10_spill] sm:$0xff] }
  0x39   : > { %473 = vst [vmem:[%s798_s25 + $0xe8] sm:$0xff] %v409_v36  ;;  %474 = vst [vmem:[%s798_s25 + $0xf0] sm:$0xff] %v410_v29  ;;  %v423_v14 = vmax.f32 %v359_v53, 0.0  ;;  %v424_v22 = vmax.f32 %v360_v52, 0.0  ;;  %v425_v26 = vmax.f32 %v361_v51, 0.0  ;;  %v293_v10 = vmul.f32 %v627_v0, %v849_v7  ;;  %v1157_v29 = vld [vmem:[#allocation2_spill] sm:$0xff] }
  0x3a   : > { %475 = vst [vmem:[%s798_s25 + $0xf8] sm:$0xff] %v411_v9  ;;  %476 = vst [vmem:[%s798_s25 + $0x100] sm:$0xff] %v412_v16  ;;  %v363_v39 = vadd.f32 %v639_v1, %v292_v56  ;;  %v426_v41 = vmax.f32 %v362_v21, 0.0  ;;  %v294_v42 = vmul.f32 %v627_v0, %v852_v6  ;;  %v295_v35 = vmul.f32 %v627_v0, %v855_v5 }
  0x3b   : > { %477 = vst [vmem:[%s798_s25 + $0x108] sm:$0xff] %v413_v17  ;;  %478 = vst [vmem:[%s798_s25 + $0x110] sm:$0xff] %v414_v18  ;;  %v296_v36 = vmul.f32 %v627_v0, %v858_v2  ;;  %v297_v28 = vmul.f32 %v627_v0, %v861_v63  ;;  %v298_v59 = vmul.f32 %v627_v0, %v1157_v29  ;;  %v1160_v17 = vld [vmem:[#allocation5_spill] sm:$0xff] }
  0x3c   : > { %479 = vst [vmem:[%s798_s25 + $0x118] sm:$0xff] %v415_v27  ;;  %480 = vst [vmem:[%s798_s25 + $0x120] sm:$0xff] %v416_v24  ;;  %v427_v58 = vmax.f32 %v363_v39, 0.0  ;;  %v364_v7 = vadd.f32 %v639_v1, %v293_v10  ;;  %v365_v6 = vadd.f32 %v639_v1, %v294_v42  ;;  %v366_v5 = vadd.f32 %v639_v1, %v295_v35  ;;  %v1161_v24 = vld [vmem:[#allocation6_spill] sm:$0xff] }
  0x3d   : > { %481 = vst [vmem:[%s798_s25 + $0x128] sm:$0xff] %v417_v32  ;;  %482 = vst [vmem:[%s798_s25 + $0x130] sm:$0xff] %v418_v33  ;;  %v299_v54 = vmul.f32 %v627_v0, %v1158_v34  ;;  %v367_v2 = vadd.f32 %v639_v1, %v296_v36  ;;  %v368_v63 = vadd.f32 %v639_v1, %v297_v28 }
  0x3e   : > { %483 = vst [vmem:[%s798_s25 + $0x138] sm:$0xff] %v419_v44  ;;  %484 = vst [vmem:[%s798_s25 + $0x140] sm:$0xff] %v420_v57  ;;  %v369_v9 = vadd.f32 %v639_v1, %v298_v59  ;;  %v300_v46 = vmul.f32 %v627_v0, %v1159_v45  ;;  %v428_v47 = vmax.f32 %v364_v7, 0.0  ;;  %v429_v11 = vmax.f32 %v365_v6, 0.0  ;;  %v1164_v44 = vld [vmem:[#allocation9_spill] sm:$0xff] }
  0x3f   : > { %485 = vst [vmem:[%s798_s25 + $0x148] sm:$0xff] %v421_v3  ;;  %486 = vst [vmem:[%s798_s25 + $0x150] sm:$0xff] %v422_v8  ;;  %v430_v12 = vmax.f32 %v366_v5, 0.0  ;;  %v370_v13 = vadd.f32 %v639_v1, %v299_v54  ;;  %v431_v31 = vmax.f32 %v367_v2, 0.0  ;;  %v432_v15 = vmax.f32 %v368_v63, 0.0 }
  0x40   : > { %487 = vst [vmem:[%s798_s25 + $0x158] sm:$0xff] %v423_v14  ;;  %488 = vst [vmem:[%s798_s25 + $0x160] sm:$0xff] %v424_v22  ;;  %v433_v19 = vmax.f32 %v369_v9, 0.0  ;;  %v371_v20 = vadd.f32 %v639_v1, %v300_v46  ;;  %v301_v16 = vmul.f32 %v627_v0, %v873_v37  ;;  %v302_v18 = vmul.f32 %v627_v0, %v1160_v17 }
  0x41   : > { %489 = vst [vmem:[%s798_s25 + $0x168] sm:$0xff] %v425_v26  ;;  %490 = vst [vmem:[%s798_s25 + $0x170] sm:$0xff] %v426_v41  ;;  %v434_v30 = vmax.f32 %v370_v13, 0.0  ;;  %v303_v23 = vmul.f32 %v627_v0, %v883_v62  ;;  %v304_v32 = vmul.f32 %v627_v0, %v1161_v24  ;;  %v305_v33 = vmul.f32 %v627_v0, %v1162_v25 }
  0x42   : > { %491 = vst [vmem:[%s798_s25 + $0x178] sm:$0xff] %v427_v58  ;;  %492 = vst [vmem:[%s798_s25 + $0x180] sm:$0xff] %v428_v47  ;;  %v435_v27 = vmax.f32 %v371_v20, 0.0  ;;  %v306_v38 = vmul.f32 %v627_v0, %v1163_v43  ;;  %v372_v37 = vadd.f32 %v639_v1, %v301_v16  ;;  %v373_v40 = vadd.f32 %v639_v1, %v302_v18 }
  0x43   : > { %493 = vst [vmem:[%s798_s25 + $0x188] sm:$0xff] %v429_v11  ;;  %494 = vst [vmem:[%s798_s25 + $0x190] sm:$0xff] %v430_v12  ;;  %v374_v62 = vadd.f32 %v639_v1, %v303_v23  ;;  %v307_v48 = vmul.f32 %v627_v0, %v1164_v44  ;;  %v375_v49 = vadd.f32 %v639_v1, %v304_v32 }
  0x44   : > { %495 = vst [vmem:[%s798_s25 + $0x198] sm:$0xff] %v431_v31  ;;  %496 = vst [vmem:[%s798_s25 + $0x1a0] sm:$0xff] %v432_v15  ;;  %v376_v50 = vadd.f32 %v639_v1, %v305_v33  ;;  %v377_v4 = vadd.f32 %v639_v1, %v306_v38  ;;  %v308_v60 = vmul.f32 %v627_v0, %v1165_v61  ;;  %v436_v55 = vmax.f32 %v372_v37, 0.0 }
  0x45   : > { %497 = vst [vmem:[%s798_s25 + $0x1a8] sm:$0xff] %v433_v19  ;;  %498 = vst [vmem:[%s798_s25 + $0x1b0] sm:$0xff] %v434_v30  ;;  %v437_v53 = vmax.f32 %v373_v40, 0.0  ;;  %v438_v52 = vmax.f32 %v374_v62, 0.0  ;;  %v378_v51 = vadd.f32 %v639_v1, %v307_v48  ;;  %v439_v56 = vmax.f32 %v375_v49, 0.0 }
  0x46   : > { %499 = vst [vmem:[%s798_s25 + $0x1b8] sm:$0xff] %v435_v27  ;;  %v440_v57 = vmax.f32 %v376_v50, 0.0  ;;  %v441_v3 = vmax.f32 %v377_v4, 0.0  ;;  %v379_v8 = vadd.f32 %v639_v1, %v308_v60  ;;  %500 = vst [vmem:[%s798_s25 + $0x1c0] sm:$0xff] %v436_v55 }
  0x47   : > { %501 = vst [vmem:[%s798_s25 + $0x1c8] sm:$0xff] %v437_v53  ;;  %502 = vst [vmem:[%s798_s25 + $0x1d0] sm:$0xff] %v438_v52  ;;  %v442_v21 = vmax.f32 %v378_v51, 0.0 }
  0x48   : > { %503 = vst [vmem:[%s798_s25 + $0x1d8] sm:$0xff] %v439_v56  ;;  %504 = vst [vmem:[%s798_s25 + $0x1e0] sm:$0xff] %v440_v57  ;;  %v443_v0 = vmax.f32 %v379_v8, 0.0 }
  0x49   : > { %505 = vst [vmem:[%s798_s25 + $0x1e8] sm:$0xff] %v441_v3  ;;  %506 = vst [vmem:[%s798_s25 + $0x1f0] sm:$0xff] %v442_v21 }
  0x4a   : > { %507 = vst [vmem:[%s798_s25 + $0x1f8] sm:$0xff] %v443_v0 }
  0x4b PF: > { %s13_s12 = sadd.s32 1, %s591_s12  }
  0x4c   : > { %p10_p4 = scmp.ge.s32.totalorder %s13_s12, 4  }
  0x4e   :  { %12 = sbr.rel (!%p10_p4) target bundleno = 1 (0x1), region = 62 }

// kernel: basic_conv_forward.3
= control target key start
LH: loop header
LB: loop body
LE: loop exit
PB: predicated region body
PF: predicated region fallthrough
CT: control target
= control target key end

     0   :  { %s1567_s9 = smov 0   ;;  %s1569_s10 = smov 0   ;;  %s1728_s0 = inlined_call_operand.vmem [shape: bf16[1024,128], index: 0, kind: input, shape index: {}]   ;;  %s1729_s1 = inlined_call_operand.vmem [shape: bf16[128,128], index: 1, kind: input, shape index: {}]   ;;  %s1730_s2 = inlined_call_operand.vmem [shape: f32[1024,128], index: 2, kind: output, shape index: {}]  }
   0x1   :  { %s1571_s11 = smov 0  }
   0x2 LB: > { %s24_s12 = sadd.s32 1, %s1546_s10  ;;  %p1281_p0 = scmp.ge.s32.totalorder %s1550_s11, 1  ;;  %s1550_s11 = sphi %s1571_s11, %s12_s11   ;;  %s1546_s10 = sphi %s1569_s10, %s1732_s10   ;;  %s1542_s9 = sphi %s1567_s9, %s1731_s9  }
   0x3   : > { %p26_p1 = scmp.ge.s32.totalorder %s24_s12, 2  ;;  %p141_p2 = scmp.lt.s32.totalorder %s1550_s11, 3 }
   0x5   : > { %s1734_s12 = smov (%p26_p1, %s24_s12), 0  ;;  %p142_p3 = pnand %p1281_p0, %p141_p2 }
   0x6   : > { %v1488_v0 = vld [vmem:[%s1729_s1] sm:$0xff] (!%p142_p3)   ;;  %s1282_s15 = sshll.u32 (!%p142_p3), %s1542_s9, 6  ;;  %v1489_v1 = vld [vmem:[%s1729_s1 + $0x8] sm:$0xff] (!%p142_p3)   ;;  %v1490_v2 = vld [vmem:[%s1729_s1 + $0x10] sm:$0xff] (!%p142_p3)  }
   0x7   : > { %145 = sbr.rel (%p142_p3) target bundleno = 311 (0x137), region = 28  ;;  %p172_p4 = scmp.lt.s32.totalorder (!%p142_p3), %s1282_s15, 127  ;;  %1368 = vmatprep.subr.bf16.mxu0 (!%p142_p3), %v1488_v0  ;;  %1448 = vmatprep.subr.bf16.mxu1 (!%p142_p3), %v1488_v0  ;;  %v1491_v3 = vld [vmem:[%s1729_s1 + $0x18] sm:$0xff] (!%p142_p3)   ;;  %v1492_v6 = vld [vmem:[%s1729_s1 + $0x20] sm:$0xff] (!%p142_p3)   ;;  %v1493_v7 = vld [vmem:[%s1729_s1 + $0x28] sm:$0xff] (!%p142_p3)  }
   0x8   : > { %1369 = vmatpush3.bf16.msra.mxu0 (!%p142_p3), %v1488_v0  ;;  %1456 = vmatpush3.bf16.msra.mxu1 (!%p142_p3), %v1488_v0  ;;  %v1494_v8 = vld [vmem:[%s1729_s1 + $0x30] sm:$0xff] (!%p142_p3)   ;;  %v1495_v9 = vld [vmem:[%s1729_s1 + $0x38] sm:$0xff] (!%p142_p3)  }
   0x9   : > { %1370 = vmatprep.subr.bf16.mxu0 (!%p142_p3), %v1489_v1  ;;  %1449 = vmatprep.subr.bf16.mxu1 (!%p142_p3), %v1489_v1 }
   0xc   : > { %1371 = vmatpush3.bf16.msra.mxu0 (!%p142_p3), %v1489_v1  ;;  %1457 = vmatpush3.bf16.msra.mxu1 (!%p142_p3), %v1489_v1 }
   0xd   : > { %1372 = vmatprep.subr.bf16.mxu0 (!%p142_p3), %v1490_v2  ;;  %1450 = vmatprep.subr.bf16.mxu1 (!%p142_p3), %v1490_v2 }
   0xe   : > { %s1736_s15 = smov (!%p172_p4, %s1282_s15), 127 }
   0xf   : > { %s1283_s20 = sshll.u32 %s1736_s15, 2  ;;  %s1285_s6 = sshll.u32 %s1736_s15, 3 }
  0x10   : > { %s1600_s23 = scalar_lea.vmem %s1728_s0, %s1283_s20  ;;  %1373 = vmatpush3.bf16.msra.mxu0 %v1490_v2  ;;  %1458 = vmatpush3.bf16.msra.mxu1 %v1490_v2  ;;  %s1653_s9 = scalar_lea.vmem %s1730_s2, %s1285_s6 }
  0x11   : > { %v1496_v4 = vld [vmem:[%s1600_s23] sm:$0xff]   ;;  %1374 = vmatprep.subr.bf16.mxu0 %v1491_v3  ;;  %1451 = vmatprep.subr.bf16.mxu1 %v1491_v3  ;;  %v1498_v10 = vld [vmem:[%s1600_s23 + $0x8] sm:$0xff]   ;;  %v1500_v12 = vld [vmem:[%s1600_s23 + $0x10] sm:$0xff]  }
  0x12   : > { %v1497_v5 = vld [vmem:[%s1600_s23 + $0x80] sm:$0xff]   ;;  %1384 = vmatprep.mubr.bf16.mxu0 %v1496_v4  ;;  %v1499_v11 = vld [vmem:[%s1600_s23 + $0x88] sm:$0xff]   ;;  %v1501_v13 = vld [vmem:[%s1600_s23 + $0x90] sm:$0xff]  }
  0x13   : > { %1416 = vmatprep.mubr.bf16.mxu1 %v1497_v5  ;;  %v1502_v14 = vld [vmem:[%s1600_s23 + $0x18] sm:$0xff]   ;;  %v1504_v16 = vld [vmem:[%s1600_s23 + $0x20] sm:$0xff]   ;;  %v1506_v18 = vld [vmem:[%s1600_s23 + $0x28] sm:$0xff]  }
  0x14   : > { %1375 = vmatpush3.bf16.msra.mxu0 %v1491_v3  ;;  %1459 = vmatpush3.bf16.msra.mxu1 %v1491_v3  ;;  %v1503_v15 = vld [vmem:[%s1600_s23 + $0x98] sm:$0xff]   ;;  %v1505_v17 = vld [vmem:[%s1600_s23 + $0xa0] sm:$0xff]   ;;  %v1507_v19 = vld [vmem:[%s1600_s23 + $0xa8] sm:$0xff]  }
  0x15   : > { %1376 = vmatprep.subr.bf16.mxu0 %v1492_v6  ;;  %1452 = vmatprep.subr.bf16.mxu1 %v1492_v6  ;;  %v1508_v20 = vld [vmem:[%s1600_s23 + $0x30] sm:$0xff]   ;;  %v1510_v22 = vld [vmem:[%s1600_s23 + $0x38] sm:$0xff]   ;;  %v1512_v24 = vld [vmem:[%s1600_s23 + $0x40] sm:$0xff]  }
  0x16   : > { %v1509_v21 = vld [vmem:[%s1600_s23 + $0xb0] sm:$0xff]   ;;  %v1511_v23 = vld [vmem:[%s1600_s23 + $0xb8] sm:$0xff]   ;;  %v1513_v25 = vld [vmem:[%s1600_s23 + $0xc0] sm:$0xff]  }
  0x17   : > { %v1514_v26 = vld [vmem:[%s1600_s23 + $0x48] sm:$0xff]   ;;  %v1516_v28 = vld [vmem:[%s1600_s23 + $0x50] sm:$0xff]   ;;  %v1518_v30 = vld [vmem:[%s1600_s23 + $0x58] sm:$0xff]  }
  0x18   : > { %1377 = vmatpush3.bf16.msra.mxu0 %v1492_v6  ;;  %1460 = vmatpush3.bf16.msra.mxu1 %v1492_v6  ;;  %v1515_v27 = vld [vmem:[%s1600_s23 + $0xc8] sm:$0xff]   ;;  %v1517_v29 = vld [vmem:[%s1600_s23 + $0xd0] sm:$0xff]   ;;  %v1519_v31 = vld [vmem:[%s1600_s23 + $0xd8] sm:$0xff]  }
  0x19   : > { %1378 = vmatprep.subr.bf16.mxu0 %v1493_v7  ;;  %1453 = vmatprep.subr.bf16.mxu1 %v1493_v7  ;;  %v1520_v32 = vld [vmem:[%s1600_s23 + $0x60] sm:$0xff]   ;;  %v1522_v34 = vld [vmem:[%s1600_s23 + $0x68] sm:$0xff]   ;;  %v1524_v36 = vld [vmem:[%s1600_s23 + $0x70] sm:$0xff]  }
  0x1a   : > { %v1521_v33 = vld [vmem:[%s1600_s23 + $0xe0] sm:$0xff]   ;;  %v1523_v35 = vld [vmem:[%s1600_s23 + $0xe8] sm:$0xff]   ;;  %v1525_v37 = vld [vmem:[%s1600_s23 + $0xf0] sm:$0xff]  }
  0x1b   : > { %v1526_v38 = vld [vmem:[%s1600_s23 + $0x78] sm:$0xff]  }
  0x1c   : > { %1379 = vmatpush3.bf16.msra.mxu0 %v1493_v7  ;;  %1461 = vmatpush3.bf16.msra.mxu1 %v1493_v7  ;;  %v1527_v39 = vld [vmem:[%s1600_s23 + $0xf8] sm:$0xff]  }
  0x1d   : > { %1380 = vmatprep.subr.bf16.mxu0 %v1494_v8  ;;  %1454 = vmatprep.subr.bf16.mxu1 %v1494_v8 }
  0x20   : > { %1381 = vmatpush3.bf16.msra.mxu0 %v1494_v8  ;;  %1462 = vmatpush3.bf16.msra.mxu1 %v1494_v8 }
  0x21   : > { %1382 = vmatprep.subr.bf16.mxu0 %v1495_v9  ;;  %1455 = vmatprep.subr.bf16.mxu1 %v1495_v9 }
  0x24   : > { %1383 = vmatpush3.bf16.msra.mxu0 %v1495_v9  ;;  %1463 = vmatpush3.bf16.msra.mxu1 %v1495_v9 }
  0x27   : > { %1385 = vmatmul.mubr.bf16.vlgmr.msra.gmra.mrb[0].mxu0 %v1498_v10  ;;  %1417 = vmatmul.mubr.bf16.vlgmr.msra.gmra.mrb[0].mxu1 %v1499_v11 }
  0x28   : > { %1388 = vmatprep.mubr.bf16.mxu0 %v1500_v12  ;;  %1420 = vmatprep.mubr.bf16.mxu1 %v1501_v13 }
  0x2f   : > { %1389 = vmatmul.mubr.bf16.gmra.mrb[4].mxu0 %v1502_v14  ;;  %1421 = vmatmul.mubr.bf16.gmra.mrb[4].mxu1 %v1503_v15 }
  0x30   : > { %1392 = vmatprep.mubr.bf16.mxu0 %v1504_v16  ;;  %1424 = vmatprep.mubr.bf16.mxu1 %v1505_v17 }
  0x37   : > { %1393 = vmatmul.mubr.bf16.gmra.mrb[8].mxu0 %v1506_v18  ;;  %1425 = vmatmul.mubr.bf16.gmra.mrb[8].mxu1 %v1507_v19 }
  0x38   : > { %1396 = vmatprep.mubr.bf16.mxu0 %v1508_v20  ;;  %1428 = vmatprep.mubr.bf16.mxu1 %v1509_v21 }
  0x3f   : > { %1397 = vmatmul.mubr.bf16.gmra.mrb[12].mxu0 %v1510_v22  ;;  %1429 = vmatmul.mubr.bf16.gmra.mrb[12].mxu1 %v1511_v23 }
  0x40   : > { %1400 = vmatprep.mubr.bf16.mxu0 %v1512_v24  ;;  %1432 = vmatprep.mubr.bf16.mxu1 %v1513_v25 }
  0x47   : > { %1401 = vmatmul.mubr.bf16.gmra.mrb[16].mxu0 %v1514_v26  ;;  %1433 = vmatmul.mubr.bf16.gmra.mrb[16].mxu1 %v1515_v27 }
  0x48   : > { %1404 = vmatprep.mubr.bf16.mxu0 %v1516_v28  ;;  %1436 = vmatprep.mubr.bf16.mxu1 %v1517_v29 }
  0x4f   : > { %1405 = vmatmul.mubr.bf16.gmra.mrb[20].mxu0 %v1518_v30  ;;  %1437 = vmatmul.mubr.bf16.gmra.mrb[20].mxu1 %v1519_v31 }
  0x50   : > { %1408 = vmatprep.mubr.bf16.mxu0 %v1520_v32  ;;  %1440 = vmatprep.mubr.bf16.mxu1 %v1521_v33 }
  0x57   : > { %1409 = vmatmul.mubr.bf16.gmra.mrb[24].mxu0 %v1522_v34  ;;  %1441 = vmatmul.mubr.bf16.gmra.mrb[24].mxu1 %v1523_v35 }
  0x58   : > { %1412 = vmatprep.mubr.bf16.mxu0 %v1524_v36  ;;  %1444 = vmatprep.mubr.bf16.mxu1 %v1525_v37 }
  0x5f   : > { %1413 = vmatmul.mubr.bf16.gmra.mrb[28].mxu0 %v1526_v38  ;;  %1445 = vmatmul.mubr.bf16.gmra.mrb[28].mxu1 %v1527_v39 }
  0xfa   : > { %v1386_v40 = vpop.f32.mrb[0].mxu0  ;;  %v1418_v41 = vpop.f32.mrb[0].mxu1 }
  0xfb   : > { %1131 = vst [vmem:[%s1653_s9 + $0x10] sm:$0xff] %v1386_v40  ;;  %1163 = vst [vmem:[%s1653_s9 + $0x110] sm:$0xff] %v1418_v41  ;;  %v679_v42 = vpop.f32.mrb[1].mxu0  ;;  %v807_v43 = vpop.f32.mrb[1].mxu1 }
  0xfc   : > { %1129 = vst [vmem:[%s1653_s9] sm:$0xff] %v679_v42  ;;  %1161 = vst [vmem:[%s1653_s9 + $0x100] sm:$0xff] %v807_v43  ;;  %v1387_v44 = vpop.f32.mrb[2].mxu0  ;;  %v1419_v45 = vpop.f32.mrb[2].mxu1 }
  0xfd   : > { %1132 = vst [vmem:[%s1653_s9 + $0x18] sm:$0xff] %v1387_v44  ;;  %1164 = vst [vmem:[%s1653_s9 + $0x118] sm:$0xff] %v1419_v45  ;;  %v682_v46 = vpop.f32.mrb[3].mxu0  ;;  %v810_v47 = vpop.f32.mrb[3].mxu1 }
  0xfe   : > { %1130 = vst [vmem:[%s1653_s9 + $0x8] sm:$0xff] %v682_v46  ;;  %1162 = vst [vmem:[%s1653_s9 + $0x108] sm:$0xff] %v810_v47 }
 0x102   : > { %v1390_v48 = vpop.f32.mrb[4].mxu0  ;;  %v1422_v49 = vpop.f32.mrb[4].mxu1 }
 0x103   : > { %1135 = vst [vmem:[%s1653_s9 + $0x30] sm:$0xff] %v1390_v48  ;;  %1167 = vst [vmem:[%s1653_s9 + $0x130] sm:$0xff] %v1422_v49  ;;  %v695_v50 = vpop.f32.mrb[5].mxu0  ;;  %v823_v51 = vpop.f32.mrb[5].mxu1 }
 0x104   : > { %1133 = vst [vmem:[%s1653_s9 + $0x20] sm:$0xff] %v695_v50  ;;  %1165 = vst [vmem:[%s1653_s9 + $0x120] sm:$0xff] %v823_v51  ;;  %v1391_v52 = vpop.f32.mrb[6].mxu0  ;;  %v1423_v53 = vpop.f32.mrb[6].mxu1 }
 0x105   : > { %1136 = vst [vmem:[%s1653_s9 + $0x38] sm:$0xff] %v1391_v52  ;;  %1168 = vst [vmem:[%s1653_s9 + $0x138] sm:$0xff] %v1423_v53  ;;  %v698_v54 = vpop.f32.mrb[7].mxu0  ;;  %v826_v55 = vpop.f32.mrb[7].mxu1 }
 0x106   : > { %1134 = vst [vmem:[%s1653_s9 + $0x28] sm:$0xff] %v698_v54  ;;  %1166 = vst [vmem:[%s1653_s9 + $0x128] sm:$0xff] %v826_v55 }
 0x10a   : > { %v1394_v56 = vpop.f32.mrb[8].mxu0  ;;  %v1426_v57 = vpop.f32.mrb[8].mxu1 }
 0x10b   : > { %1139 = vst [vmem:[%s1653_s9 + $0x50] sm:$0xff] %v1394_v56  ;;  %1171 = vst [vmem:[%s1653_s9 + $0x150] sm:$0xff] %v1426_v57  ;;  %v711_v58 = vpop.f32.mrb[9].mxu0  ;;  %v839_v59 = vpop.f32.mrb[9].mxu1 }
 0x10c   : > { %1137 = vst [vmem:[%s1653_s9 + $0x40] sm:$0xff] %v711_v58  ;;  %1169 = vst [vmem:[%s1653_s9 + $0x140] sm:$0xff] %v839_v59  ;;  %v1395_v60 = vpop.f32.mrb[10].mxu0  ;;  %v1427_v61 = vpop.f32.mrb[10].mxu1 }
 0x10d   : > { %1140 = vst [vmem:[%s1653_s9 + $0x58] sm:$0xff] %v1395_v60  ;;  %1172 = vst [vmem:[%s1653_s9 + $0x158] sm:$0xff] %v1427_v61  ;;  %v714_v62 = vpop.f32.mrb[11].mxu0  ;;  %v842_v63 = vpop.f32.mrb[11].mxu1 }
 0x10e   : > { %1138 = vst [vmem:[%s1653_s9 + $0x48] sm:$0xff] %v714_v62  ;;  %1170 = vst [vmem:[%s1653_s9 + $0x148] sm:$0xff] %v842_v63 }
 0x112   : > { %v1398_v0 = vpop.f32.mrb[12].mxu0  ;;  %v1430_v1 = vpop.f32.mrb[12].mxu1 }
 0x113   : > { %1143 = vst [vmem:[%s1653_s9 + $0x70] sm:$0xff] %v1398_v0  ;;  %1175 = vst [vmem:[%s1653_s9 + $0x170] sm:$0xff] %v1430_v1  ;;  %v727_v2 = vpop.f32.mrb[13].mxu0  ;;  %v855_v3 = vpop.f32.mrb[13].mxu1 }
 0x114   : > { %1141 = vst [vmem:[%s1653_s9 + $0x60] sm:$0xff] %v727_v2  ;;  %1173 = vst [vmem:[%s1653_s9 + $0x160] sm:$0xff] %v855_v3  ;;  %v1399_v4 = vpop.f32.mrb[14].mxu0  ;;  %v1431_v5 = vpop.f32.mrb[14].mxu1 }
 0x115   : > { %1144 = vst [vmem:[%s1653_s9 + $0x78] sm:$0xff] %v1399_v4  ;;  %1176 = vst [vmem:[%s1653_s9 + $0x178] sm:$0xff] %v1431_v5  ;;  %v730_v6 = vpop.f32.mrb[15].mxu0  ;;  %v858_v7 = vpop.f32.mrb[15].mxu1 }
 0x116   : > { %1142 = vst [vmem:[%s1653_s9 + $0x68] sm:$0xff] %v730_v6  ;;  %1174 = vst [vmem:[%s1653_s9 + $0x168] sm:$0xff] %v858_v7 }
 0x11a   : > { %v1402_v8 = vpop.f32.mrb[16].mxu0  ;;  %v1434_v9 = vpop.f32.mrb[16].mxu1 }
 0x11b   : > { %1147 = vst [vmem:[%s1653_s9 + $0x90] sm:$0xff] %v1402_v8  ;;  %1179 = vst [vmem:[%s1653_s9 + $0x190] sm:$0xff] %v1434_v9  ;;  %v743_v10 = vpop.f32.mrb[17].mxu0  ;;  %v871_v11 = vpop.f32.mrb[17].mxu1 }
 0x11c   : > { %1145 = vst [vmem:[%s1653_s9 + $0x80] sm:$0xff] %v743_v10  ;;  %1177 = vst [vmem:[%s1653_s9 + $0x180] sm:$0xff] %v871_v11  ;;  %v1403_v12 = vpop.f32.mrb[18].mxu0  ;;  %v1435_v13 = vpop.f32.mrb[18].mxu1 }
 0x11d   : > { %1148 = vst [vmem:[%s1653_s9 + $0x98] sm:$0xff] %v1403_v12  ;;  %1180 = vst [vmem:[%s1653_s9 + $0x198] sm:$0xff] %v1435_v13  ;;  %v746_v14 = vpop.f32.mrb[19].mxu0  ;;  %v874_v15 = vpop.f32.mrb[19].mxu1 }
 0x11e   : > { %1146 = vst [vmem:[%s1653_s9 + $0x88] sm:$0xff] %v746_v14  ;;  %1178 = vst [vmem:[%s1653_s9 + $0x188] sm:$0xff] %v874_v15 }
 0x122   : > { %v1406_v16 = vpop.f32.mrb[20].mxu0  ;;  %v1438_v17 = vpop.f32.mrb[20].mxu1 }
 0x123   : > { %1151 = vst [vmem:[%s1653_s9 + $0xb0] sm:$0xff] %v1406_v16  ;;  %1183 = vst [vmem:[%s1653_s9 + $0x1b0] sm:$0xff] %v1438_v17  ;;  %v759_v18 = vpop.f32.mrb[21].mxu0  ;;  %v887_v19 = vpop.f32.mrb[21].mxu1 }
 0x124   : > { %1149 = vst [vmem:[%s1653_s9 + $0xa0] sm:$0xff] %v759_v18  ;;  %1181 = vst [vmem:[%s1653_s9 + $0x1a0] sm:$0xff] %v887_v19  ;;  %v1407_v20 = vpop.f32.mrb[22].mxu0  ;;  %v1439_v21 = vpop.f32.mrb[22].mxu1 }
 0x125   : > { %1152 = vst [vmem:[%s1653_s9 + $0xb8] sm:$0xff] %v1407_v20  ;;  %1184 = vst [vmem:[%s1653_s9 + $0x1b8] sm:$0xff] %v1439_v21  ;;  %v762_v22 = vpop.f32.mrb[23].mxu0  ;;  %v890_v23 = vpop.f32.mrb[23].mxu1 }
 0x126   : > { %1150 = vst [vmem:[%s1653_s9 + $0xa8] sm:$0xff] %v762_v22  ;;  %1182 = vst [vmem:[%s1653_s9 + $0x1a8] sm:$0xff] %v890_v23 }
 0x12a   : > { %v1410_v24 = vpop.f32.mrb[24].mxu0  ;;  %v1442_v25 = vpop.f32.mrb[24].mxu1 }
 0x12b   : > { %1155 = vst [vmem:[%s1653_s9 + $0xd0] sm:$0xff] %v1410_v24  ;;  %1187 = vst [vmem:[%s1653_s9 + $0x1d0] sm:$0xff] %v1442_v25  ;;  %v775_v26 = vpop.f32.mrb[25].mxu0  ;;  %v903_v27 = vpop.f32.mrb[25].mxu1 }
 0x12c   : > { %1153 = vst [vmem:[%s1653_s9 + $0xc0] sm:$0xff] %v775_v26  ;;  %1185 = vst [vmem:[%s1653_s9 + $0x1c0] sm:$0xff] %v903_v27  ;;  %v1411_v28 = vpop.f32.mrb[26].mxu0  ;;  %v1443_v29 = vpop.f32.mrb[26].mxu1 }
 0x12d   : > { %1156 = vst [vmem:[%s1653_s9 + $0xd8] sm:$0xff] %v1411_v28  ;;  %1188 = vst [vmem:[%s1653_s9 + $0x1d8] sm:$0xff] %v1443_v29  ;;  %v778_v30 = vpop.f32.mrb[27].mxu0  ;;  %v906_v31 = vpop.f32.mrb[27].mxu1 }
 0x12e   : > { %1154 = vst [vmem:[%s1653_s9 + $0xc8] sm:$0xff] %v778_v30  ;;  %1186 = vst [vmem:[%s1653_s9 + $0x1c8] sm:$0xff] %v906_v31 }
 0x132   : > { %v1414_v32 = vpop.f32.mrb[28].mxu0  ;;  %v1446_v33 = vpop.f32.mrb[28].mxu1 }
 0x133   : > { %1159 = vst [vmem:[%s1653_s9 + $0xf0] sm:$0xff] %v1414_v32  ;;  %1191 = vst [vmem:[%s1653_s9 + $0x1f0] sm:$0xff] %v1446_v33  ;;  %v791_v34 = vpop.f32.mrb[29].mxu0  ;;  %v919_v35 = vpop.f32.mrb[29].mxu1 }
 0x134   : > { %1157 = vst [vmem:[%s1653_s9 + $0xe0] sm:$0xff] %v791_v34  ;;  %1189 = vst [vmem:[%s1653_s9 + $0x1e0] sm:$0xff] %v919_v35  ;;  %v1415_v36 = vpop.f32.mrb[30].mxu0  ;;  %v1447_v37 = vpop.f32.mrb[30].mxu1 }
 0x135   : > { %1160 = vst [vmem:[%s1653_s9 + $0xf8] sm:$0xff] %v1415_v36  ;;  %1192 = vst [vmem:[%s1653_s9 + $0x1f8] sm:$0xff] %v1447_v37  ;;  %v794_v38 = vpop.f32.mrb[31].mxu0  ;;  %v922_v39 = vpop.f32.mrb[31].mxu1 }
 0x136   : > { %1158 = vst [vmem:[%s1653_s9 + $0xe8] sm:$0xff] %v794_v38  ;;  %1190 = vst [vmem:[%s1653_s9 + $0x1e8] sm:$0xff] %v922_v39 }
 0x137 PF: > { %s12_s11 = sadd.s32 1, %s1550_s11   ;;  %s1731_s9 = smov %s1546_s10 }
 0x138   : > { %p9_p5 = scmp.ge.s32.totalorder %s12_s11, 4   ;;  %s1732_s10 = smov %s1734_s12 }
 0x13a   :  { %11 = sbr.rel (!%p9_p5) target bundleno = 2 (0x2), region = 69 }

</bundles_post_ra>
